<compile_context>
chip_gen: v5e
topology: v5e:2x2
jax: 0.10.0
libtpu: 0.0.40
codegen_flags: <defaults>
</compile_context>

<pallas_src>
import functools
import math

import jax
import jax.numpy as jnp
from jax import lax
from jax.experimental import pallas as pl
from jax.experimental.pallas import tpu as pltpu

ALPHA = 0.2          # LeakyReLU negative slope (module default)
_SUM_EPS = 1e-20     # guards zero-degree / padded rows in the masked softmax


# ----------------------------------------------------------------------------
# Generation-aware configuration (safe fallbacks everywhere).
# ----------------------------------------------------------------------------
@functools.lru_cache(maxsize=None)
def _tpu_profile():
    kind = ""
    try:
        kind = jax.devices()[0].device_kind.lower()
    except Exception:
        pass
    # bf16 VPU/EUP only on v6e/v7x; keep the f32 elementwise path elsewhere.
    bf16_elementwise = ("v6" in kind) or ("v7" in kind)
    # chips with 2 TensorCores per chip: make sure the grid has >= 2 row blocks.
    two_cores = ("v7" in kind) or ("v4" in kind) or ("v5p" in kind)
    try:
        vmem_phys = int(pltpu.get_tpu_info().vmem_capacity_bytes)
    except Exception:
        vmem_phys = 0
    if vmem_phys <= 0:
        vmem_phys = (64 if ("v7" in kind or not kind) else 128) * 1024 * 1024
    vmem_limit = (vmem_phys * 3) // 4      # ~96 MiB on v5e/v6e, ~48 MiB on v7x
    tile_budget = vmem_limit // 2          # per-step working-set budget
    return dict(
        compute_dtype=jnp.bfloat16 if bf16_elementwise else jnp.float32,
        two_cores=two_cores,
        vmem_limit=int(vmem_limit),
        tile_budget=int(tile_budget),
    )


def _choose_row_tile(n_pad, per_row_bytes, resident_bytes, tile_budget, two_cores):
    """Largest multiple-of-128 divisor of n_pad whose per-step working set fits."""
    nb = n_pad // 128
    cands = [128 * d for d in range(1, nb + 1) if nb % d == 0]
    if two_cores and n_pad >= 256:
        cands = [c for c in cands if c <= n_pad // 2] or [128]
    avail = max(tile_budget - resident_bytes, 128 * per_row_bytes)
    fits = [c for c in cands if c * per_row_bytes <= avail]
    return max(fits) if fits else 128


# ----------------------------------------------------------------------------
# Kernel 1: fused projection.  One MXU pass over the x row block computes every
# head's V projection AND both folded attention-logit projections.
# ----------------------------------------------------------------------------
def _proj_kernel(x_ref, w_ref, v_ref, elog_ref, *, hfout):
    out = jnp.dot(x_ref[...], w_ref[...],
                  preferred_element_type=jnp.float32)   # (TQ, H*Fout + 2H)
    v_ref[...] = out[:, :hfout].astype(v_ref.dtype)     # (TQ, H*Fout)  bf16
    elog_ref[...] = out[:, hfout:].astype(elog_ref.dtype)  # (TQ, 2H) [es | ed]


def _project(x, wcat, *, nheads, hfout, tq, compute_dtype, vmem_limit):
    n_pad, fin = x.shape
    tot = wcat.shape[1]
    kernel = functools.partial(_proj_kernel, hfout=hfout)
    flops = 2 * n_pad * fin * tot
    bytes_accessed = (x.size + wcat.size) * 2 + n_pad * hfout * 2 \
        + 2 * nheads * n_pad * jnp.dtype(compute_dtype).itemsize
    return pl.pallas_call(
        kernel,
        out_shape=(jax.ShapeDtypeStruct((n_pad, hfout), jnp.bfloat16),
                   jax.ShapeDtypeStruct((n_pad, 2 * nheads), compute_dtype)),
        grid_spec=pltpu.PrefetchScalarGridSpec(
            num_scalar_prefetch=0,
            grid=(n_pad // tq,),
            in_specs=[
                pl.BlockSpec((tq, fin), lambda i: (i, 0)),
                # TODO(synk): this grid-invariant weight block could be single-
                # buffered to free VMEM; default buffering kept for portability.
                pl.BlockSpec((fin, tot), lambda i: (0, 0)),
            ],
            out_specs=(
                pl.BlockSpec((tq, hfout), lambda i: (i, 0)),
                pl.BlockSpec((tq, 2 * nheads), lambda i: (i, 0)),
            ),
        ),
        compiler_params=pltpu.CompilerParams(
            dimension_semantics=("parallel",),
            vmem_limit_bytes=vmem_limit),
        cost_estimate=pl.CostEstimate(flops=int(flops), transcendentals=0,
                                      bytes_accessed=int(bytes_accessed)),
    )(x, wcat)


# ----------------------------------------------------------------------------
# Kernel 2: per-row-block masked attention + aggregation, fori_loop over heads.
# ----------------------------------------------------------------------------
def _attention_kernel(es_ref, edt_ref, v_ref, adj_ref, out_ref, *,
                      nheads, alpha, final):
    # int8 {0,1} adjacency -> compute dtype, hoisted ONCE per row block and
    # reused by every head.
    adjf = adj_ref[...].astype(es_ref.dtype)            # (TQ, Npad)

    def head_body(h, carry):
        # e[i,j] = leakyrelu( x_i.(W a1) + x_j.(Q a2) )  for head h
        e = es_ref[h] + edt_ref[h]                       # (TQ,1)+(1,Npad)->(TQ,Npad)
        e = jnp.maximum(e, alpha * e)                    # LeakyReLU: one max pass
        m = jnp.max(e, axis=1, keepdims=True)            # row max over unmasked e
        p = adjf * jnp.exp(e - m)                        # masked, unnormalised probs
        s = jnp.sum(p.astype(jnp.float32), axis=1, keepdims=True)      # (TQ, 1)
        acc = jnp.dot(p.astype(jnp.bfloat16), v_ref[h],
                      preferred_element_type=jnp.float32)               # (TQ, Fout)
        # normalise the small aggregate (EUP reciprocal); guard degree-0 rows
        z = acc * pl.reciprocal(jnp.maximum(s, _SUM_EPS), approx=True)
        z = jnp.where(z > 0, z, jnp.exp(z) - 1.0)        # ELU
        if final:                                        # elu(out_att) -> log_softmax
            mm = jnp.max(z, axis=1, keepdims=True)
            sh = z - mm
            z = sh - jnp.log(jnp.sum(jnp.exp(sh), axis=1, keepdims=True))
        out_ref[h] = z.astype(out_ref.dtype)
        return carry

    lax.fori_loop(0, nheads, head_body, 0)


def _attend(es3, edt3, v3, adj_i8, *, tq, nheads, fout, final, vmem_limit):
    n_pad = adj_i8.shape[0]
    out_dtype = jnp.float32 if final else jnp.bfloat16
    kernel = functools.partial(_attention_kernel, nheads=nheads, alpha=ALPHA,
                               final=final)
    flops = 2 * nheads * n_pad * n_pad * fout + 6 * nheads * n_pad * n_pad
    bytes_accessed = n_pad * n_pad + v3.size * 2 \
        + es3.size * es3.dtype.itemsize + edt3.size * edt3.dtype.itemsize \
        + nheads * n_pad * fout * jnp.dtype(out_dtype).itemsize
    # TODO(synk): for very large graphs on v7x (64 MiB VMEM) add a column tile
    # with flash-style online softmax instead of keeping v / e_dst resident.
    return pl.pallas_call(
        kernel,
        out_shape=jax.ShapeDtypeStruct((nheads, n_pad, fout), out_dtype),
        grid_spec=pltpu.PrefetchScalarGridSpec(
            num_scalar_prefetch=0,
            grid=(n_pad // tq,),
            in_specs=[
                pl.BlockSpec((nheads, tq, 1), lambda i: (0, i, 0)),       # e_src rows
                pl.BlockSpec((nheads, 1, n_pad), lambda i: (0, 0, 0)),    # e_dst (resident)
                pl.BlockSpec((nheads, n_pad, fout), lambda i: (0, 0, 0)), # v     (resident)
                pl.BlockSpec((tq, n_pad), lambda i: (i, 0)),              # adj rows (int8)
            ],
            out_specs=pl.BlockSpec((nheads, tq, fout), lambda i: (0, i, 0)),
        ),
        compiler_params=pltpu.CompilerParams(
            dimension_semantics=("parallel",),
            vmem_limit_bytes=vmem_limit),
        cost_estimate=pl.CostEstimate(flops=int(flops),
                                      transcendentals=int(nheads * n_pad * n_pad),
                                      bytes_accessed=int(bytes_accessed)),
    )(es3, edt3, v3, adj_i8)


# ----------------------------------------------------------------------------
# Layer / network wrappers
# ----------------------------------------------------------------------------
def gat_layer(x_pad, adj_i8, W, Q, V, a1, a2, *, final):
    """Stacked multi-head GraphAttentionLayer on a zero-padded graph (eval mode)."""
    cfg = _tpu_profile()
    n_pad, fin = x_pad.shape
    nheads, _, fout = W.shape
    hfout = nheads * fout
    cdt = cfg["compute_dtype"]
    cs = jnp.dtype(cdt).itemsize
    out_b = 4 if final else 2

    # Fold a1/a2 into the input-side projections ((xW)@a1 == x@(W a1)) and fuse
    # all per-head V projections + both folded logit projections into ONE matrix.
    wa1 = jnp.matmul(W, a1)[..., 0].T                          # (Fin, H)
    qa2 = jnp.matmul(Q, a2)[..., 0].T                          # (Fin, H)
    v_w = jnp.transpose(V, (1, 0, 2)).reshape(fin, hfout)      # head-major columns
    wcat = jnp.concatenate([v_w, wa1, qa2], axis=1).astype(jnp.bfloat16)

    # VMEM accounting (double-buffered) -> row tile choice.
    per_row = n_pad * (2 * 1 + 3 * cs) + 4 * fin + 4 * hfout \
        + 2 * nheads * (fout * out_b + 3 * cs)
    resident = 2 * (n_pad * hfout * 2 + nheads * n_pad * cs) \
        + 2 * fin * (hfout + 2 * nheads) * 2
    tq = _choose_row_tile(n_pad, per_row, resident,
                          cfg["tile_budget"], cfg["two_cores"])

    v_slab, elog = _project(x_pad.astype(jnp.bfloat16), wcat,
                            nheads=nheads, hfout=hfout, tq=tq,
                            compute_dtype=cdt, vmem_limit=cfg["vmem_limit"])

    # Tiny layout glue in XLA (O(N*H) / O(N*H*Fout) elements; negligible next to
    # the N^2 attention work; keeps sub-lane-width transposes out of the kernels).
    v3 = jnp.transpose(v_slab.reshape(n_pad, nheads, fout), (1, 0, 2))  # (H,N,Fout)
    es3 = jnp.transpose(elog[:, :nheads])[:, :, None]                   # (H,N,1)
    edt3 = jnp.transpose(elog[:, nheads:])[:, None, :]                  # (H,1,N)

    out3 = _attend(es3, edt3, v3, adj_i8, tq=tq, nheads=nheads, fout=fout,
                   final=final, vmem_limit=cfg["vmem_limit"])           # (H,N,Fout)
    if final:
        return out3[0]                                                  # (N, nclass)
    return jnp.transpose(out3, (1, 0, 2)).reshape(n_pad, hfout)         # (N, H*Fout)


def gat_forward(x, adj, params):
    """Two-layer GAT forward (eval mode: all F.dropout calls are identity)."""
    n = x.shape[0]
    n_pad = max(128, -(-n // 128) * 128)            # pad only to a multiple of 128
    pad = n_pad - n
    x_pad = jnp.pad(x, ((0, pad), (0, 0))).astype(jnp.bfloat16)
    # int8 {0,1} adjacency: half the bf16 bytes for the N^2 stream
    adj_i8 = jnp.pad((adj > 0).astype(jnp.int8), ((0, pad), (0, pad)))
    # TODO(synk): real zero-degree rows (none when self-loops exist) come out as 0
    # here, whereas the reference yields a degenerate uniform softmax over all nodes.

    heads = gat_layer(x_pad, adj_i8, params["W_h"], params["Q_h"], params["V_h"],
                      params["a1_h"], params["a2_h"], final=False)   # (Npad, H*nhid)
    out = gat_layer(heads, adj_i8, params["W_o"], params["Q_o"], params["V_o"],
                    params["a1_o"], params["a2_o"], final=True)      # (Npad, nclass)
    return out[:n]


# ----------------------------------------------------------------------------
# Pure-JAX reference (f32) matching the PyTorch module
# ----------------------------------------------------------------------------
def _gat_layer_ref(x, adj, W, Q, V, a1, a2):
    outs = []
    for h in range(W.shape[0]):
        hm = x @ W[h]
        qm = x @ Q[h]
        vm = x @ V[h]
        e = jax.nn.leaky_relu(hm @ a1[h] + (qm @ a2[h]).T, negative_slope=ALPHA)
        att = jax.nn.softmax(jnp.where(adj > 0, e, -9e15), axis=1)
        outs.append(att @ vm)
    return jnp.concatenate(outs, axis=1)


def gat_forward_ref(x, adj, params):
    h = jax.nn.elu(_gat_layer_ref(x, adj, params["W_h"], params["Q_h"],
                                  params["V_h"], params["a1_h"], params["a2_h"]))
    z = jax.nn.elu(_gat_layer_ref(h, adj, params["W_o"], params["Q_o"],
                                  params["V_o"], params["a1_o"], params["a2_o"]))
    return jax.nn.log_softmax(z, axis=1)


# ----------------------------------------------------------------------------
# Parameter init (xavier_uniform, gain=1.414 as in the PyTorch module)
# ----------------------------------------------------------------------------
def _xavier_uniform(key, shape, gain=1.414):
    fan_in, fan_out = shape[-2], shape[-1]
    bound = gain * math.sqrt(6.0 / (fan_in + fan_out))
    return jax.random.uniform(key, shape, jnp.float32, -bound, bound)


def init_gat_params(key, nfeat, nhid, nclass, nheads):
    ks = jax.random.split(key, 8)
    params = {
        "W_h": _xavier_uniform(ks[0], (nheads, nfeat, nhid)),
        "Q_h": _xavier_uniform(ks[1], (nheads, nfeat, nhid)),
        "V_h": _xavier_uniform(ks[2], (nheads, nfeat, nhid)),
        "W_o": _xavier_uniform(ks[3], (1, nhid * nheads, nclass)),
        "Q_o": _xavier_uniform(ks[4], (1, nhid * nheads, nclass)),
        "V_o": _xavier_uniform(ks[5], (1, nhid * nheads, nclass)),
    }
    a_h = _xavier_uniform(ks[6], (nheads, 2 * nhid, 1))
    params["a1_h"] = a_h[:, :nhid, :]
    params["a2_h"] = a_h[:, nhid:, :]
    a_o = _xavier_uniform(ks[7], (1, 2 * nclass, 1))
    params["a1_o"] = a_o[:, :nclass, :]
    params["a2_o"] = a_o[:, nclass:, :]
    return params


if __name__ == "__main__":
    # Small synthetic problem: N=8 nodes, nfeat=16, nhid=8, nheads=2, nclass=4
    N, nfeat, nhid, nclass, nheads = 8, 16, 8, 4, 2

    key = jax.random.PRNGKey(0)
    kx, kadj, kp = jax.random.split(key, 3)

    x = jax.random.normal(kx, (N, nfeat), jnp.float32)
    adj = (jax.random.uniform(kadj, (N, N)) > 0.5).astype(jnp.float32)
    adj = jnp.maximum(adj, adj.T)                        # symmetric
    adj = adj.at[jnp.arange(N), jnp.arange(N)].set(1.0)  # self loops

    params = init_gat_params(kp, nfeat, nhid, nclass, nheads)

    out = jax.jit(gat_forward)(x, adj, params)
    out = jax.block_until_ready(out)

    assert out.shape == (N, nclass)
    assert bool(jnp.all(jnp.isfinite(out)))
    # rows of log_softmax must exponentiate-sum to ~1
    assert bool(jnp.allclose(jnp.sum(jnp.exp(out), axis=1), 1.0, atol=1e-4))

    # loose tolerance vs. f32 reference: bf16 MXU operands / activations + approx recip
    ref = gat_forward_ref(x, adj, params)
    assert float(jnp.max(jnp.abs(out - ref))) < 0.25

    print("KERNEL_OK")
</pallas_src>

<mosaic_0001>
module attributes {stable_mosaic.version = 11 : i64} {
  func.func @_proj_kernel(%arg0: i32, %arg1: memref<128x16xbf16, #tpu.memory_space<vmem>>, %arg2: memref<16x20xbf16, #tpu.memory_space<vmem>>, %arg3: memref<128x16xbf16, #tpu.memory_space<vmem>>, %arg4: memref<128x4xf32, #tpu.memory_space<vmem>>) attributes {dimension_semantics = [#tpu.dimension_semantics<parallel>], iteration_bounds = array<i64: 1>, scalar_prefetch = 0 : i64, scratch_operands = 0 : i64, tpu.core_type = #tpu.core_type<tc>, window_params = [{transform_indices = @transform_0, window_bounds = array<i64: 128, 16>}, {pipeline_mode = #tpu.pipeline_mode<synchronous>, transform_indices = @transform_1, window_bounds = array<i64: 16, 20>}, {transform_indices = @transform_2, window_bounds = array<i64: 128, 16>}, {transform_indices = @transform_3, window_bounds = array<i64: 128, 4>}]} {
    %c0 = arith.constant 0 : index
    %c0_0 = arith.constant 0 : index
    %0 = vector.load %arg1[%c0, %c0_0] : memref<128x16xbf16, #tpu.memory_space<vmem>>, vector<128x16xbf16>
    %c0_1 = arith.constant 0 : index
    %c0_2 = arith.constant 0 : index
    %1 = vector.load %arg2[%c0_1, %c0_2] : memref<16x20xbf16, #tpu.memory_space<vmem>>, vector<16x20xbf16>
    %cst = arith.constant dense<0.000000e+00> : vector<128x20xf32>
    %2 = tpu.matmul %0, %1, %cst {dimension_numbers = #tpu.dot_dimension_numbers<[1], [0], [0], [1], [0, 0, 1, 1], [], []>} : vector<128x16xbf16>, vector<16x20xbf16>, vector<128x20xf32> -> vector<128x20xf32>
    %3 = vector.extract_strided_slice %2 {offsets = [0, 0], sizes = [128, 16], strides = [1, 1]} : vector<128x20xf32> to vector<128x16xf32>
    %4 = arith.truncf %3 : vector<128x16xf32> to vector<128x16xbf16>
    %c0_3 = arith.constant 0 : index
    %c0_4 = arith.constant 0 : index
    %5 = vector.load %arg3[%c0_3, %c0_4] : memref<128x16xbf16, #tpu.memory_space<vmem>>, vector<128x16xbf16>
    tpu.vector_store %arg3[%c0_3, %c0_4], %4 {strides = array<i32>} : memref<128x16xbf16, #tpu.memory_space<vmem>>, vector<128x16xbf16>,
    %6 = vector.extract_strided_slice %2 {offsets = [0, 16], sizes = [128, 4], strides = [1, 1]} : vector<128x20xf32> to vector<128x4xf32>
    %c0_5 = arith.constant 0 : index
    %c0_6 = arith.constant 0 : index
    %7 = vector.load %arg4[%c0_5, %c0_6] : memref<128x4xf32, #tpu.memory_space<vmem>>, vector<128x4xf32>
    tpu.vector_store %arg4[%c0_5, %c0_6], %6 {strides = array<i32>} : memref<128x4xf32, #tpu.memory_space<vmem>>, vector<128x4xf32>,
    return
  }
  func.func @transform_0(%arg0: i32) -> (i32, i32) {
    %c0_i32 = arith.constant 0 : i32
    %c0_i32_0 = arith.constant 0 : i32
    return %arg0, %c0_i32 : i32, i32
  }
  func.func @transform_1(%arg0: i32) -> (i32, i32) {
    %c0_i32 = arith.constant 0 : i32
    %c0_i32_0 = arith.constant 0 : i32
    %c0_i32_1 = arith.constant 0 : i32
    return %c0_i32, %c0_i32_0 : i32, i32
  }
  func.func @transform_2(%arg0: i32) -> (i32, i32) {
    %c0_i32 = arith.constant 0 : i32
    %c0_i32_0 = arith.constant 0 : i32
    return %arg0, %c0_i32 : i32, i32
  }
  func.func @transform_3(%arg0: i32) -> (i32, i32) {
    %c0_i32 = arith.constant 0 : i32
    %c0_i32_0 = arith.constant 0 : i32
    return %arg0, %c0_i32 : i32, i32
  }
}

module attributes {stable_mosaic.version = 11 : i64} {
  func.func @_attention_kernel(%arg0: i32, %arg1: memref<2x128x1xf32, #tpu.memory_space<vmem>>, %arg2: memref<2x1x128xf32, #tpu.memory_space<vmem>>, %arg3: memref<2x128x8xbf16, #tpu.memory_space<vmem>>, %arg4: memref<128x128xi8, #tpu.memory_space<vmem>>, %arg5: memref<2x128x8xbf16, #tpu.memory_space<vmem>>) attributes {dimension_semantics = [#tpu.dimension_semantics<parallel>], iteration_bounds = array<i64: 1>, scalar_prefetch = 0 : i64, scratch_operands = 0 : i64, tpu.core_type = #tpu.core_type<tc>, window_params = [{transform_indices = @transform_0, window_bounds = array<i64: 2, 128, 1>}, {pipeline_mode = #tpu.pipeline_mode<synchronous>, transform_indices = @transform_1, window_bounds = array<i64: 2, 1, 128>}, {pipeline_mode = #tpu.pipeline_mode<synchronous>, transform_indices = @transform_2, window_bounds = array<i64: 2, 128, 8>}, {transform_indices = @transform_3, window_bounds = array<i64: 128, 128>}, {transform_indices = @transform_4, window_bounds = array<i64: 2, 128, 8>}]} {
    %c0 = arith.constant 0 : index
    %c0_0 = arith.constant 0 : index
    %0 = vector.load %arg4[%c0, %c0_0] : memref<128x128xi8, #tpu.memory_space<vmem>>, vector<128x128xi8>
    %1 = arith.sitofp %0 : vector<128x128xi8> to vector<128x128xf32>
    %c0_i32 = arith.constant 0 : i32
    %c2_i32 = arith.constant 2 : i32
    %2 = arith.addi %c0_i32, %c2_i32 : i32
    %c1_i32 = arith.constant 1 : i32
    scf.for %arg6 = %c0_i32 to %2 step %c1_i32  : i32 {
      %3 = arith.index_cast %arg6 : i32 to index
      %c0_2 = arith.constant 0 : index
      %c0_3 = arith.constant 0 : index
      %4 = vector.load %arg1[%3, %c0_2, %c0_3] : memref<2x128x1xf32, #tpu.memory_space<vmem>>, vector<1x128x1xf32>
      %5 = vector.shape_cast %4 : vector<1x128x1xf32> to vector<128x1xf32>
      %6 = arith.index_cast %arg6 : i32 to index
      %c0_4 = arith.constant 0 : index
      %c0_5 = arith.constant 0 : index
      %7 = vector.load %arg2[%6, %c0_4, %c0_5] : memref<2x1x128xf32, #tpu.memory_space<vmem>>, vector<1x1x128xf32>
      %8 = vector.shape_cast %7 : vector<1x1x128xf32> to vector<1x128xf32>
      %9 = vector.broadcast %5 : vector<128x1xf32> to vector<128x128xf32>
      %10 = vector.broadcast %8 : vector<1x128xf32> to vector<128x128xf32>
      %11 = arith.addf %9, %10 : vector<128x128xf32>
      %cst = arith.constant 2.000000e-01 : f32
      %12 = vector.broadcast %cst : f32 to vector<128x128xf32>
      %13 = arith.mulf %12, %11 : vector<128x128xf32>
      %14 = arith.maximumf %11, %13 : vector<128x128xf32>
      %cst_6 = arith.constant dense<0xFF800000> : vector<128xf32>
      %15 = vector.multi_reduction <maximumf>, %14, %cst_6 [1] : vector<128x128xf32> to vector<128xf32>
      %16 = vector.shape_cast %15 : vector<128xf32> to vector<128x1xf32>
      %17 = vector.broadcast %16 : vector<128x1xf32> to vector<128x128xf32>
      %18 = arith.subf %14, %17 : vector<128x128xf32>
      %19 = math.exp %18 : vector<128x128xf32>
      %20 = arith.mulf %1, %19 : vector<128x128xf32>
      %cst_7 = arith.constant dense<0.000000e+00> : vector<128xf32>
      %21 = vector.multi_reduction <add>, %20, %cst_7 [1] : vector<128x128xf32> to vector<128xf32>
      %22 = vector.shape_cast %21 : vector<128xf32> to vector<128x1xf32>
      %23 = arith.truncf %20 : vector<128x128xf32> to vector<128x128xbf16>
      %24 = arith.index_cast %arg6 : i32 to index
      %c0_8 = arith.constant 0 : index
      %c0_9 = arith.constant 0 : index
      %25 = vector.load %arg3[%24, %c0_8, %c0_9] : memref<2x128x8xbf16, #tpu.memory_space<vmem>>, vector<1x128x8xbf16>
      %26 = vector.shape_cast %25 : vector<1x128x8xbf16> to vector<128x8xbf16>
      %cst_10 = arith.constant dense<0.000000e+00> : vector<128x8xf32>
      %27 = tpu.matmul %23, %26, %cst_10 {dimension_numbers = #tpu.dot_dimension_numbers<[1], [0], [0], [1], [0, 0, 1, 1], [], []>} : vector<128x128xbf16>, vector<128x8xbf16>, vector<128x8xf32> -> vector<128x8xf32>
      %cst_11 = arith.constant 9.99999968E-21 : f32
      %28 = vector.broadcast %cst_11 : f32 to vector<128x1xf32>
      %29 = arith.maximumf %22, %28 : vector<128x1xf32>
      %30 = tpu.reciprocal %29 {approx = true} : vector<128x1xf32> -> vector<128x1xf32>
      %31 = vector.broadcast %30 : vector<128x1xf32> to vector<128x8xf32>
      %32 = arith.mulf %27, %31 : vector<128x8xf32>
      %cst_12 = arith.constant 0.000000e+00 : f32
      %33 = vector.broadcast %cst_12 : f32 to vector<128x8xf32>
      %34 = arith.cmpf ogt, %32, %33 : vector<128x8xf32>
      %35 = math.exp %32 : vector<128x8xf32>
      %cst_13 = arith.constant 1.000000e+00 : f32
      %36 = vector.broadcast %cst_13 : f32 to vector<128x8xf32>
      %37 = arith.subf %35, %36 : vector<128x8xf32>
      %38 = arith.select %34, %32, %37 : vector<128x8xi1>, vector<128x8xf32>
      %39 = arith.truncf %38 : vector<128x8xf32> to vector<128x8xbf16>
      %40 = arith.index_cast %arg6 : i32 to index
      %c0_14 = arith.constant 0 : index
      %c0_15 = arith.constant 0 : index
      %41 = vector.load %arg5[%40, %c0_14, %c0_15] : memref<2x128x8xbf16, #tpu.memory_space<vmem>>, vector<1x128x8xbf16>
      %42 = vector.shape_cast %41 : vector<1x128x8xbf16> to vector<128x8xbf16>
      %43 = vector.shape_cast %39 : vector<128x8xbf16> to vector<1x128x8xbf16>
      tpu.vector_store %arg5[%40, %c0_14, %c0_15], %43 {strides = array<i32>} : memref<2x128x8xbf16, #tpu.memory_space<vmem>>, vector<1x128x8xbf16>,
    }
    %c2_i32_1 = arith.constant 2 : i32
    return
  }
  func.func @transform_0(%arg0: i32) -> (i32, i32, i32) {
    %c0_i32 = arith.constant 0 : i32
    %c0_i32_0 = arith.constant 0 : i32
    %c0_i32_1 = arith.constant 0 : i32
    return %c0_i32, %arg0, %c0_i32_0 : i32, i32, i32
  }
  func.func @transform_1(%arg0: i32) -> (i32, i32, i32) {
    %c0_i32 = arith.constant 0 : i32
    %c0_i32_0 = arith.constant 0 : i32
    %c0_i32_1 = arith.constant 0 : i32
    %c0_i32_2 = arith.constant 0 : i32
    return %c0_i32, %c0_i32_0, %c0_i32_1 : i32, i32, i32
  }
  func.func @transform_2(%arg0: i32) -> (i32, i32, i32) {
    %c0_i32 = arith.constant 0 : i32
    %c0_i32_0 = arith.constant 0 : i32
    %c0_i32_1 = arith.constant 0 : i32
    %c0_i32_2 = arith.constant 0 : i32
    return %c0_i32, %c0_i32_0, %c0_i32_1 : i32, i32, i32
  }
  func.func @transform_3(%arg0: i32) -> (i32, i32) {
    %c0_i32 = arith.constant 0 : i32
    %c0_i32_0 = arith.constant 0 : i32
    return %arg0, %c0_i32 : i32, i32
  }
  func.func @transform_4(%arg0: i32) -> (i32, i32, i32) {
    %c0_i32 = arith.constant 0 : i32
    %c0_i32_0 = arith.constant 0 : i32
    %c0_i32_1 = arith.constant 0 : i32
    return %c0_i32, %arg0, %c0_i32_0 : i32, i32, i32
  }
}

module attributes {stable_mosaic.version = 11 : i64} {
  func.func @_proj_kernel(%arg0: i32, %arg1: memref<128x16xbf16, #tpu.memory_space<vmem>>, %arg2: memref<16x6xbf16, #tpu.memory_space<vmem>>, %arg3: memref<128x4xbf16, #tpu.memory_space<vmem>>, %arg4: memref<128x2xf32, #tpu.memory_space<vmem>>) attributes {dimension_semantics = [#tpu.dimension_semantics<parallel>], iteration_bounds = array<i64: 1>, scalar_prefetch = 0 : i64, scratch_operands = 0 : i64, tpu.core_type = #tpu.core_type<tc>, window_params = [{transform_indices = @transform_0, window_bounds = array<i64: 128, 16>}, {pipeline_mode = #tpu.pipeline_mode<synchronous>, transform_indices = @transform_1, window_bounds = array<i64: 16, 6>}, {transform_indices = @transform_2, window_bounds = array<i64: 128, 4>}, {transform_indices = @transform_3, window_bounds = array<i64: 128, 2>}]} {
    %c0 = arith.constant 0 : index
    %c0_0 = arith.constant 0 : index
    %0 = vector.load %arg1[%c0, %c0_0] : memref<128x16xbf16, #tpu.memory_space<vmem>>, vector<128x16xbf16>
    %c0_1 = arith.constant 0 : index
    %c0_2 = arith.constant 0 : index
    %1 = vector.load %arg2[%c0_1, %c0_2] : memref<16x6xbf16, #tpu.memory_space<vmem>>, vector<16x6xbf16>
    %cst = arith.constant dense<0.000000e+00> : vector<128x6xf32>
    %2 = tpu.matmul %0, %1, %cst {dimension_numbers = #tpu.dot_dimension_numbers<[1], [0], [0], [1], [0, 0, 1, 1], [], []>} : vector<128x16xbf16>, vector<16x6xbf16>, vector<128x6xf32> -> vector<128x6xf32>
    %3 = vector.extract_strided_slice %2 {offsets = [0, 0], sizes = [128, 4], strides = [1, 1]} : vector<128x6xf32> to vector<128x4xf32>
    %4 = arith.truncf %3 : vector<128x4xf32> to vector<128x4xbf16>
    %c0_3 = arith.constant 0 : index
    %c0_4 = arith.constant 0 : index
    %5 = vector.load %arg3[%c0_3, %c0_4] : memref<128x4xbf16, #tpu.memory_space<vmem>>, vector<128x4xbf16>
    tpu.vector_store %arg3[%c0_3, %c0_4], %4 {strides = array<i32>} : memref<128x4xbf16, #tpu.memory_space<vmem>>, vector<128x4xbf16>,
    %6 = vector.extract_strided_slice %2 {offsets = [0, 4], sizes = [128, 2], strides = [1, 1]} : vector<128x6xf32> to vector<128x2xf32>
    %c0_5 = arith.constant 0 : index
    %c0_6 = arith.constant 0 : index
    %7 = vector.load %arg4[%c0_5, %c0_6] : memref<128x2xf32, #tpu.memory_space<vmem>>, vector<128x2xf32>
    tpu.vector_store %arg4[%c0_5, %c0_6], %6 {strides = array<i32>} : memref<128x2xf32, #tpu.memory_space<vmem>>, vector<128x2xf32>,
    return
  }
  func.func @transform_0(%arg0: i32) -> (i32, i32) {
    %c0_i32 = arith.constant 0 : i32
    %c0_i32_0 = arith.constant 0 : i32
    return %arg0, %c0_i32 : i32, i32
  }
  func.func @transform_1(%arg0: i32) -> (i32, i32) {
    %c0_i32 = arith.constant 0 : i32
    %c0_i32_0 = arith.constant 0 : i32
    %c0_i32_1 = arith.constant 0 : i32
    return %c0_i32, %c0_i32_0 : i32, i32
  }
  func.func @transform_2(%arg0: i32) -> (i32, i32) {
    %c0_i32 = arith.constant 0 : i32
    %c0_i32_0 = arith.constant 0 : i32
    return %arg0, %c0_i32 : i32, i32
  }
  func.func @transform_3(%arg0: i32) -> (i32, i32) {
    %c0_i32 = arith.constant 0 : i32
    %c0_i32_0 = arith.constant 0 : i32
    return %arg0, %c0_i32 : i32, i32
  }
}

module attributes {stable_mosaic.version = 11 : i64} {
  func.func @_attention_kernel(%arg0: i32, %arg1: memref<1x128x1xf32, #tpu.memory_space<vmem>>, %arg2: memref<1x1x128xf32, #tpu.memory_space<vmem>>, %arg3: memref<1x128x4xbf16, #tpu.memory_space<vmem>>, %arg4: memref<128x128xi8, #tpu.memory_space<vmem>>, %arg5: memref<1x128x4xf32, #tpu.memory_space<vmem>>) attributes {dimension_semantics = [#tpu.dimension_semantics<parallel>], iteration_bounds = array<i64: 1>, scalar_prefetch = 0 : i64, scratch_operands = 0 : i64, tpu.core_type = #tpu.core_type<tc>, window_params = [{transform_indices = @transform_0, window_bounds = array<i64: 1, 128, 1>}, {pipeline_mode = #tpu.pipeline_mode<synchronous>, transform_indices = @transform_1, window_bounds = array<i64: 1, 1, 128>}, {pipeline_mode = #tpu.pipeline_mode<synchronous>, transform_indices = @transform_2, window_bounds = array<i64: 1, 128, 4>}, {transform_indices = @transform_3, window_bounds = array<i64: 128, 128>}, {transform_indices = @transform_4, window_bounds = array<i64: 1, 128, 4>}]} {
    %c0 = arith.constant 0 : index
    %c0_0 = arith.constant 0 : index
    %0 = vector.load %arg4[%c0, %c0_0] : memref<128x128xi8, #tpu.memory_space<vmem>>, vector<128x128xi8>
    %1 = arith.sitofp %0 : vector<128x128xi8> to vector<128x128xf32>
    %c0_i32 = arith.constant 0 : i32
    %2 = arith.index_cast %c0_i32 : i32 to index
    %c0_1 = arith.constant 0 : index
    %c0_2 = arith.constant 0 : index
    %3 = vector.load %arg1[%2, %c0_1, %c0_2] : memref<1x128x1xf32, #tpu.memory_space<vmem>>, vector<1x128x1xf32>
    %4 = vector.shape_cast %3 : vector<1x128x1xf32> to vector<128x1xf32>
    %5 = arith.index_cast %c0_i32 : i32 to index
    %c0_3 = arith.constant 0 : index
    %c0_4 = arith.constant 0 : index
    %6 = vector.load %arg2[%5, %c0_3, %c0_4] : memref<1x1x128xf32, #tpu.memory_space<vmem>>, vector<1x1x128xf32>
    %7 = vector.shape_cast %6 : vector<1x1x128xf32> to vector<1x128xf32>
    %8 = vector.broadcast %4 : vector<128x1xf32> to vector<128x128xf32>
    %9 = vector.broadcast %7 : vector<1x128xf32> to vector<128x128xf32>
    %10 = arith.addf %8, %9 : vector<128x128xf32>
    %cst = arith.constant 2.000000e-01 : f32
    %11 = vector.broadcast %cst : f32 to vector<128x128xf32>
    %12 = arith.mulf %11, %10 : vector<128x128xf32>
    %13 = arith.maximumf %10, %12 : vector<128x128xf32>
    %cst_5 = arith.constant dense<0xFF800000> : vector<128xf32>
    %14 = vector.multi_reduction <maximumf>, %13, %cst_5 [1] : vector<128x128xf32> to vector<128xf32>
    %15 = vector.shape_cast %14 : vector<128xf32> to vector<128x1xf32>
    %16 = vector.broadcast %15 : vector<128x1xf32> to vector<128x128xf32>
    %17 = arith.subf %13, %16 : vector<128x128xf32>
    %18 = math.exp %17 : vector<128x128xf32>
    %19 = arith.mulf %1, %18 : vector<128x128xf32>
    %cst_6 = arith.constant dense<0.000000e+00> : vector<128xf32>
    %20 = vector.multi_reduction <add>, %19, %cst_6 [1] : vector<128x128xf32> to vector<128xf32>
    %21 = vector.shape_cast %20 : vector<128xf32> to vector<128x1xf32>
    %22 = arith.truncf %19 : vector<128x128xf32> to vector<128x128xbf16>
    %23 = arith.index_cast %c0_i32 : i32 to index
    %c0_7 = arith.constant 0 : index
    %c0_8 = arith.constant 0 : index
    %24 = vector.load %arg3[%23, %c0_7, %c0_8] : memref<1x128x4xbf16, #tpu.memory_space<vmem>>, vector<1x128x4xbf16>
    %25 = vector.shape_cast %24 : vector<1x128x4xbf16> to vector<128x4xbf16>
    %cst_9 = arith.constant dense<0.000000e+00> : vector<128x4xf32>
    %26 = tpu.matmul %22, %25, %cst_9 {dimension_numbers = #tpu.dot_dimension_numbers<[1], [0], [0], [1], [0, 0, 1, 1], [], []>} : vector<128x128xbf16>, vector<128x4xbf16>, vector<128x4xf32> -> vector<128x4xf32>
    %cst_10 = arith.constant 9.99999968E-21 : f32
    %27 = vector.broadcast %cst_10 : f32 to vector<128x1xf32>
    %28 = arith.maximumf %21, %27 : vector<128x1xf32>
    %29 = tpu.reciprocal %28 {approx = true} : vector<128x1xf32> -> vector<128x1xf32>
    %30 = vector.broadcast %29 : vector<128x1xf32> to vector<128x4xf32>
    %31 = arith.mulf %26, %30 : vector<128x4xf32>
    %cst_11 = arith.constant 0.000000e+00 : f32
    %32 = vector.broadcast %cst_11 : f32 to vector<128x4xf32>
    %33 = arith.cmpf ogt, %31, %32 : vector<128x4xf32>
    %34 = math.exp %31 : vector<128x4xf32>
    %cst_12 = arith.constant 1.000000e+00 : f32
    %35 = vector.broadcast %cst_12 : f32 to vector<128x4xf32>
    %36 = arith.subf %34, %35 : vector<128x4xf32>
    %37 = arith.select %33, %31, %36 : vector<128x4xi1>, vector<128x4xf32>
    %cst_13 = arith.constant dense<0xFF800000> : vector<128xf32>
    %38 = vector.multi_reduction <maximumf>, %37, %cst_13 [1] : vector<128x4xf32> to vector<128xf32>
    %39 = vector.shape_cast %38 : vector<128xf32> to vector<128x1xf32>
    %40 = vector.broadcast %39 : vector<128x1xf32> to vector<128x4xf32>
    %41 = arith.subf %37, %40 : vector<128x4xf32>
    %42 = math.exp %41 : vector<128x4xf32>
    %cst_14 = arith.constant dense<0.000000e+00> : vector<128xf32>
    %43 = vector.multi_reduction <add>, %42, %cst_14 [1] : vector<128x4xf32> to vector<128xf32>
    %44 = vector.shape_cast %43 : vector<128xf32> to vector<128x1xf32>
    %45 = math.log %44 : vector<128x1xf32>
    %46 = vector.broadcast %45 : vector<128x1xf32> to vector<128x4xf32>
    %47 = arith.subf %41, %46 : vector<128x4xf32>
    %48 = arith.index_cast %c0_i32 : i32 to index
    %c0_15 = arith.constant 0 : index
    %c0_16 = arith.constant 0 : index
    %49 = vector.load %arg5[%48, %c0_15, %c0_16] : memref<1x128x4xf32, #tpu.memory_space<vmem>>, vector<1x128x4xf32>
    %50 = vector.shape_cast %49 : vector<1x128x4xf32> to vector<128x4xf32>
    %51 = vector.shape_cast %47 : vector<128x4xf32> to vector<1x128x4xf32>
    tpu.vector_store %arg5[%48, %c0_15, %c0_16], %51 {strides = array<i32>} : memref<1x128x4xf32, #tpu.memory_space<vmem>>, vector<1x128x4xf32>,
    %c1_i32 = arith.constant 1 : i32
    return
  }
  func.func @transform_0(%arg0: i32) -> (i32, i32, i32) {
    %c0_i32 = arith.constant 0 : i32
    %c0_i32_0 = arith.constant 0 : i32
    %c0_i32_1 = arith.constant 0 : i32
    return %c0_i32, %arg0, %c0_i32_0 : i32, i32, i32
  }
  func.func @transform_1(%arg0: i32) -> (i32, i32, i32) {
    %c0_i32 = arith.constant 0 : i32
    %c0_i32_0 = arith.constant 0 : i32
    %c0_i32_1 = arith.constant 0 : i32
    %c0_i32_2 = arith.constant 0 : i32
    return %c0_i32, %c0_i32_0, %c0_i32_1 : i32, i32, i32
  }
  func.func @transform_2(%arg0: i32) -> (i32, i32, i32) {
    %c0_i32 = arith.constant 0 : i32
    %c0_i32_0 = arith.constant 0 : i32
    %c0_i32_1 = arith.constant 0 : i32
    %c0_i32_2 = arith.constant 0 : i32
    return %c0_i32, %c0_i32_0, %c0_i32_1 : i32, i32, i32
  }
  func.func @transform_3(%arg0: i32) -> (i32, i32) {
    %c0_i32 = arith.constant 0 : i32
    %c0_i32_0 = arith.constant 0 : i32
    return %arg0, %c0_i32 : i32, i32
  }
  func.func @transform_4(%arg0: i32) -> (i32, i32, i32) {
    %c0_i32 = arith.constant 0 : i32
    %c0_i32_0 = arith.constant 0 : i32
    %c0_i32_1 = arith.constant 0 : i32
    return %c0_i32, %arg0, %c0_i32_0 : i32, i32, i32
  }
}

</mosaic_0001>

<bundles_post_ra>
// kernel: gat_forward.4
= control target key start
LH: loop header
LB: loop body
LE: loop exit
PB: predicated region body
PF: predicated region fallthrough
CT: control target
= control target key end

     0   :  { %vm78_vm0 = vcmask 130048   ;;  %vm168_vm1 = vcmask 125952   ;;  %s331_s29 = smov 112   ;;  %vm249_vm2 = vcmask 31744   ;;  %s531_s1 = inlined_call_operand.vmem [shape: bf16[16,20], index: 1, kind: input, shape index: {}]   ;;  %s532_s0 = inlined_call_operand.vmem [shape: bf16[128,16], index: 0, kind: input, shape index: {}]   ;;  %s533_s2 = inlined_call_operand.vmem [shape: bf16[128,16], index: 2, kind: output, shape index: {0}]   ;;  %s534_s3 = inlined_call_operand.vmem [shape: f32[128,4], index: 3, kind: output, shape index: {1}]  }
   0x1   :  { %v326_v0 = vld [vmem:[%s531_s1] sm:$0xff]  ;;  %v320_v2 = vld [vmem:[%s532_s0 + $0x10] sm:$0xff]  ;;  %v319_v5 = vld [vmem:[%s532_s0 + $0x8] sm:$0xff] }
   0x2   :  { %v318_v1 = vld [vmem:[%s532_s0] sm:$0xff]  ;;  %110 = vmatpush.bf16.msra.mxu0 %v326_v0  ;;  %327 = vmatpush.bf16.msra.mxu1 %v326_v0  ;;  %v324_v4 = vld [vmem:[%s532_s0 + $0x30] sm:$0xff]  ;;  %v321_v6 = vld [vmem:[%s532_s0 + $0x18] sm:$0xff] }
   0x3   :  { %v322_v3 = vld [vmem:[%s532_s0 + $0x20] sm:$0xff]  ;;  %328 = vmatpush.bf16.msra.mxu2 %v326_v0  ;;  %329 = vmatpush.bf16.msra.mxu3 %v326_v0  ;;  %v323_v7 = vld [vmem:[%s532_s0 + $0x28] sm:$0xff]  ;;  %v325_v8 = vld [vmem:[%s532_s0 + $0x38] sm:$0xff] }
   0x5   :  { %310 = vmatmul.msk.bf16.vlgmr.msra.gmra.mxu0 %vm78_vm0, %v318_v1  ;;  %312 = vmatmul.msk.bf16.vlgmr.msra.gmra.mxu1 %vm78_vm0, %v320_v2 }
   0x6   :  { %314 = vmatmul.msk.bf16.vlgmr.msra.gmra.mxu2 %vm78_vm0, %v322_v3  ;;  %316 = vmatmul.msk.bf16.vlgmr.msra.gmra.mxu3 %vm78_vm0, %v324_v4 }
  0x15   :  { %311 = vmatmul.msk.bf16.gmra.mxu0 %vm78_vm0, %v319_v5  ;;  %313 = vmatmul.msk.bf16.gmra.mxu1 %vm78_vm0, %v321_v6 }
  0x16   :  { %315 = vmatmul.msk.bf16.gmra.mxu2 %vm78_vm0, %v323_v7  ;;  %317 = vmatmul.msk.bf16.gmra.mxu3 %vm78_vm0, %v325_v8 }
  0x82   :  { %v112_v9 = vpop.f32.mrf.mxu0  ;;  %v122_v10 = vpop.f32.mrf.mxu1 }
  0x83   :  { %v152_v11 = vpack.c.bf16 %v112_v9, %v112_v9  ;;  %v156_v12 = vpack.c.bf16 %v122_v10, %v122_v10  ;;  %209 = vrot.lane.b32.xlu2 %v122_v10, %s331_s29  ;;  %201 = vrot.lane.b32.xlu0 %v112_v9, %s331_s29 }
  0x85   :  { %169 = vst.msk [vmem:[%s533_s2] sm:$0xf] %vm168_vm1, %v152_v11 }
  0x86   :  { %173 = vst.msk [vmem:[%s533_s2 + $0x10] sm:$0xf] %vm168_vm1, %v156_v12 }
  0x89   :  { %v132_v13 = vpop.f32.mrf.mxu2  ;;  %v142_v14 = vpop.f32.mrf.mxu3 }
  0x8a   :  { %v160_v15 = vpack.c.bf16 %v132_v13, %v132_v13  ;;  %v114_v16 = vpop.f32.mrf.mxu0  ;;  %v164_v17 = vpack.c.bf16 %v142_v14, %v142_v14  ;;  %v124_v18 = vpop.f32.mrf.mxu1 }
  0x8b   :  { %v153_v19 = vpack.c.bf16 %v114_v16, %v114_v16  ;;  %217 = vrot.lane.b32.xlu2 %v132_v13, %s331_s29  ;;  %225 = vrot.lane.b32.xlu0 %v142_v14, %s331_s29  ;;  %v157_v20 = vpack.c.bf16 %v124_v18, %v124_v18 }
  0x8c   :  { %177 = vst.msk [vmem:[%s533_s2 + $0x20] sm:$0xf] %vm168_vm1, %v160_v15 }
  0x8d   :  { %170 = vst.msk [vmem:[%s533_s2 + $0x4] sm:$0xf] %vm168_vm1, %v153_v19 }
  0x8e   :  { %181 = vst.msk [vmem:[%s533_s2 + $0x30] sm:$0xf] %vm168_vm1, %v164_v17 }
  0x8f   :  { %174 = vst.msk [vmem:[%s533_s2 + $0x14] sm:$0xf] %vm168_vm1, %v157_v20 }
  0x91   :  { %v134_v21 = vpop.f32.mrf.mxu2  ;;  %v144_v22 = vpop.f32.mrf.mxu3 }
  0x92   :  { %v161_v23 = vpack.c.bf16 %v134_v21, %v134_v21  ;;  %v117_v24 = vpop.f32.mrf.mxu0  ;;  %v165_v25 = vpack.c.bf16 %v144_v22, %v144_v22  ;;  %v127_v26 = vpop.f32.mrf.mxu1 }
  0x93   :  { %v154_v27 = vpack.c.bf16 %v117_v24, %v117_v24  ;;  %211 = vrot.lane.b32.xlu2 %v124_v18, %s331_s29  ;;  %203 = vrot.lane.b32.xlu0 %v114_v16, %s331_s29  ;;  %v158_v28 = vpack.c.bf16 %v127_v26, %v127_v26 }
  0x94   :  { %178 = vst.msk [vmem:[%s533_s2 + $0x24] sm:$0xf] %vm168_vm1, %v161_v23  ;;  %205 = vrot.lane.b32.xlu1 %v117_v24, %s331_s29 }
  0x95   :  { %171 = vst.msk [vmem:[%s533_s2 + $0x8] sm:$0xf] %vm168_vm1, %v154_v27 }
  0x96   :  { %182 = vst.msk [vmem:[%s533_s2 + $0x34] sm:$0xf] %vm168_vm1, %v165_v25 }
  0x97   :  { %175 = vst.msk [vmem:[%s533_s2 + $0x18] sm:$0xf] %vm168_vm1, %v158_v28 }
  0x99   :  { %v137_v29 = vpop.f32.mrf.mxu2  ;;  %v147_v30 = vpop.f32.mrf.mxu3 }
  0x9a   :  { %v162_v31 = vpack.c.bf16 %v137_v29, %v137_v29  ;;  %v119_v32 = vpop.f32.mrf.mxu0  ;;  %v129_v33 = vpop.f32.mrf.mxu1  ;;  %v166_v36 = vpack.c.bf16 %v147_v30, %v147_v30 }
  0x9b   :  { %v155_v34 = vpack.c.bf16 %v119_v32, %v119_v32  ;;  %219 = vrot.lane.b32.xlu0 %v134_v21, %s331_s29  ;;  %v159_v35 = vpack.c.bf16 %v129_v33, %v129_v33 }
  0x9c   :  { %179 = vst.msk [vmem:[%s533_s2 + $0x28] sm:$0xf] %vm168_vm1, %v162_v31  ;;  %221 = vrot.lane.b32.xlu1 %v137_v29, %s331_s29 }
  0x9d   :  { %172 = vst.msk [vmem:[%s533_s2 + $0xc] sm:$0xf] %vm168_vm1, %v155_v34 }
  0x9e   :  { %176 = vst.msk [vmem:[%s533_s2 + $0x1c] sm:$0xf] %vm168_vm1, %v159_v35 }
  0x9f   :  { %183 = vst.msk [vmem:[%s533_s2 + $0x38] sm:$0xf] %vm168_vm1, %v166_v36 }
  0xa1   :  { %v139_v37 = vpop.f32.mrf.mxu2  ;;  %v149_v38 = vpop.f32.mrf.mxu3 }
  0xa2   :  { %v163_v39 = vpack.c.bf16 %v139_v37, %v139_v37  ;;  %223 = vrot.lane.b32.xlu2 %v139_v37, %s331_s29  ;;  %v167_v40 = vpack.c.bf16 %v149_v38, %v149_v38 }
  0xa3   :  { %213 = vrot.lane.b32.xlu0 %v127_v26, %s331_s29 }
  0xa4   :  { %180 = vst.msk [vmem:[%s533_s2 + $0x2c] sm:$0xf] %vm168_vm1, %v163_v39  ;;  %207 = vrot.lane.b32.xlu1 %v119_v32, %s331_s29 }
  0xa5   :  { %184 = vst.msk [vmem:[%s533_s2 + $0x3c] sm:$0xf] %vm168_vm1, %v167_v40 }
  0xaa   :  { %229 = vrot.lane.b32.xlu2 %v147_v30, %s331_s29 }
  0xab   :  { %231 = vrot.lane.b32.xlu0 %v149_v38, %s331_s29 }
  0xac   :  { %215 = vrot.lane.b32.xlu1 %v129_v33, %s331_s29 }
  0xb4   :  { %227 = vrot.lane.b32.xlu1 %v144_v22, %s331_s29 }
  0xdd   :  { %v210_v41 = vpop.permute.xlu2 %209 }
  0xde   :  { %254 = vst.msk [vmem:[%s534_s3 + $0x20] sm:$0xff] %vm249_vm2, %v210_v41 }
  0xe5   :  { %v218_v42 = vpop.permute.xlu2 %217 }
  0xe6   :  { %258 = vst.msk [vmem:[%s534_s3 + $0x40] sm:$0xff] %vm249_vm2, %v218_v42 }
  0xed   :  { %v212_v43 = vpop.permute.xlu2 %211 }
  0xee   :  { %255 = vst.msk [vmem:[%s534_s3 + $0x28] sm:$0xff] %vm249_vm2, %v212_v43 }
  0xf5   :  { %v202_v44 = vpop.permute.xlu0 %201 }
  0xf6   :  { %250 = vst.msk [vmem:[%s534_s3] sm:$0xff] %vm249_vm2, %v202_v44 }
  0xfc   :  { %v224_v45 = vpop.permute.xlu2 %223 }
  0xfd   :  { %261 = vst.msk [vmem:[%s534_s3 + $0x58] sm:$0xff] %vm249_vm2, %v224_v45  ;;  %v226_v46 = vpop.permute.xlu0 %225 }
  0xfe   :  { %262 = vst.msk [vmem:[%s534_s3 + $0x60] sm:$0xff] %vm249_vm2, %v226_v46 }
 0x104   :  { %v230_v47 = vpop.permute.xlu2 %229 }
 0x105   :  { %264 = vst.msk [vmem:[%s534_s3 + $0x70] sm:$0xff] %vm249_vm2, %v230_v47  ;;  %v204_v48 = vpop.permute.xlu0 %203 }
 0x106   :  { %251 = vst.msk [vmem:[%s534_s3 + $0x8] sm:$0xff] %vm249_vm2, %v204_v48  ;;  %v206_v49 = vpop.permute.xlu1 %205 }
 0x107   :  { %252 = vst.msk [vmem:[%s534_s3 + $0x10] sm:$0xff] %vm249_vm2, %v206_v49 }
 0x10d   :  { %v220_v50 = vpop.permute.xlu0 %219 }
 0x10e   :  { %259 = vst.msk [vmem:[%s534_s3 + $0x48] sm:$0xff] %vm249_vm2, %v220_v50  ;;  %v222_v51 = vpop.permute.xlu1 %221 }
 0x10f   :  { %260 = vst.msk [vmem:[%s534_s3 + $0x50] sm:$0xff] %vm249_vm2, %v222_v51 }
 0x115   :  { %v214_v52 = vpop.permute.xlu0 %213 }
 0x116   :  { %256 = vst.msk [vmem:[%s534_s3 + $0x30] sm:$0xff] %vm249_vm2, %v214_v52  ;;  %v208_v53 = vpop.permute.xlu1 %207 }
 0x117   :  { %253 = vst.msk [vmem:[%s534_s3 + $0x18] sm:$0xff] %vm249_vm2, %v208_v53 }
 0x11d   :  { %v232_v54 = vpop.permute.xlu0 %231 }
 0x11e   :  { %265 = vst.msk [vmem:[%s534_s3 + $0x78] sm:$0xff] %vm249_vm2, %v232_v54  ;;  %v216_v55 = vpop.permute.xlu1 %215 }
 0x11f   :  { %257 = vst.msk [vmem:[%s534_s3 + $0x38] sm:$0xff] %vm249_vm2, %v216_v55 }
 0x126   :  { %v228_v56 = vpop.permute.xlu1 %227 }
 0x127   :  { %263 = vst.msk [vmem:[%s534_s3 + $0x68] sm:$0xff] %vm249_vm2, %v228_v56 }

// kernel: gat_forward.6
= control target key start
LH: loop header
LB: loop body
LE: loop exit
PB: predicated region body
PF: predicated region fallthrough
CT: control target
= control target key end

     0   :  { %vm78_vm0 = vcmask 130048   ;;  %vm168_vm1 = vcmask 27648   ;;  %s331_s29 = smov 124   ;;  %vm249_vm2 = vcmask 15360   ;;  %s531_s1 = inlined_call_operand.vmem [shape: bf16[16,6], index: 1, kind: input, shape index: {}]   ;;  %s532_s0 = inlined_call_operand.vmem [shape: bf16[128,16], index: 0, kind: input, shape index: {}]   ;;  %s533_s2 = inlined_call_operand.vmem [shape: bf16[128,4], index: 2, kind: output, shape index: {0}]   ;;  %s534_s3 = inlined_call_operand.vmem [shape: f32[128,2], index: 3, kind: output, shape index: {1}]  }
   0x1   :  { %v326_v0 = vld [vmem:[%s531_s1] sm:$0xff]  ;;  %v320_v2 = vld [vmem:[%s532_s0 + $0x10] sm:$0xff]  ;;  %v319_v5 = vld [vmem:[%s532_s0 + $0x8] sm:$0xff] }
   0x2   :  { %v318_v1 = vld [vmem:[%s532_s0] sm:$0xff]  ;;  %110 = vmatpush.bf16.msra.mxu0 %v326_v0  ;;  %327 = vmatpush.bf16.msra.mxu1 %v326_v0  ;;  %v324_v4 = vld [vmem:[%s532_s0 + $0x30] sm:$0xff]  ;;  %v321_v6 = vld [vmem:[%s532_s0 + $0x18] sm:$0xff] }
   0x3   :  { %v322_v3 = vld [vmem:[%s532_s0 + $0x20] sm:$0xff]  ;;  %328 = vmatpush.bf16.msra.mxu2 %v326_v0  ;;  %329 = vmatpush.bf16.msra.mxu3 %v326_v0  ;;  %v323_v7 = vld [vmem:[%s532_s0 + $0x28] sm:$0xff]  ;;  %v325_v8 = vld [vmem:[%s532_s0 + $0x38] sm:$0xff] }
   0x5   :  { %310 = vmatmul.msk.bf16.vlgmr.msra.gmra.mxu0 %vm78_vm0, %v318_v1  ;;  %312 = vmatmul.msk.bf16.vlgmr.msra.gmra.mxu1 %vm78_vm0, %v320_v2 }
   0x6   :  { %314 = vmatmul.msk.bf16.vlgmr.msra.gmra.mxu2 %vm78_vm0, %v322_v3  ;;  %316 = vmatmul.msk.bf16.vlgmr.msra.gmra.mxu3 %vm78_vm0, %v324_v4 }
  0x15   :  { %311 = vmatmul.msk.bf16.gmra.mxu0 %vm78_vm0, %v319_v5  ;;  %313 = vmatmul.msk.bf16.gmra.mxu1 %vm78_vm0, %v321_v6 }
  0x16   :  { %315 = vmatmul.msk.bf16.gmra.mxu2 %vm78_vm0, %v323_v7  ;;  %317 = vmatmul.msk.bf16.gmra.mxu3 %vm78_vm0, %v325_v8 }
  0x82   :  { %v112_v9 = vpop.f32.mrf.mxu0  ;;  %v122_v10 = vpop.f32.mrf.mxu1 }
  0x83   :  { %v152_v11 = vpack.c.bf16 %v112_v9, %v112_v9  ;;  %v156_v12 = vpack.c.bf16 %v122_v10, %v122_v10  ;;  %209 = vrot.lane.b32.xlu2 %v122_v10, %s331_s29  ;;  %201 = vrot.lane.b32.xlu0 %v112_v9, %s331_s29 }
  0x85   :  { %169 = vst.msk [vmem:[%s533_s2] sm:$0xf] %vm168_vm1, %v152_v11 }
  0x86   :  { %173 = vst.msk [vmem:[%s533_s2 + $0x10] sm:$0xf] %vm168_vm1, %v156_v12 }
  0x89   :  { %v132_v13 = vpop.f32.mrf.mxu2  ;;  %v142_v14 = vpop.f32.mrf.mxu3 }
  0x8a   :  { %v160_v15 = vpack.c.bf16 %v132_v13, %v132_v13  ;;  %v114_v16 = vpop.f32.mrf.mxu0  ;;  %v164_v17 = vpack.c.bf16 %v142_v14, %v142_v14  ;;  %v124_v18 = vpop.f32.mrf.mxu1 }
  0x8b   :  { %v153_v19 = vpack.c.bf16 %v114_v16, %v114_v16  ;;  %217 = vrot.lane.b32.xlu2 %v132_v13, %s331_s29  ;;  %225 = vrot.lane.b32.xlu0 %v142_v14, %s331_s29  ;;  %v157_v20 = vpack.c.bf16 %v124_v18, %v124_v18 }
  0x8c   :  { %177 = vst.msk [vmem:[%s533_s2 + $0x20] sm:$0xf] %vm168_vm1, %v160_v15 }
  0x8d   :  { %170 = vst.msk [vmem:[%s533_s2 + $0x4] sm:$0xf] %vm168_vm1, %v153_v19 }
  0x8e   :  { %181 = vst.msk [vmem:[%s533_s2 + $0x30] sm:$0xf] %vm168_vm1, %v164_v17 }
  0x8f   :  { %174 = vst.msk [vmem:[%s533_s2 + $0x14] sm:$0xf] %vm168_vm1, %v157_v20 }
  0x91   :  { %v134_v21 = vpop.f32.mrf.mxu2  ;;  %v144_v22 = vpop.f32.mrf.mxu3 }
  0x92   :  { %v161_v23 = vpack.c.bf16 %v134_v21, %v134_v21  ;;  %v117_v24 = vpop.f32.mrf.mxu0  ;;  %v165_v25 = vpack.c.bf16 %v144_v22, %v144_v22  ;;  %v127_v26 = vpop.f32.mrf.mxu1 }
  0x93   :  { %v154_v27 = vpack.c.bf16 %v117_v24, %v117_v24  ;;  %211 = vrot.lane.b32.xlu2 %v124_v18, %s331_s29  ;;  %203 = vrot.lane.b32.xlu0 %v114_v16, %s331_s29  ;;  %v158_v28 = vpack.c.bf16 %v127_v26, %v127_v26 }
  0x94   :  { %178 = vst.msk [vmem:[%s533_s2 + $0x24] sm:$0xf] %vm168_vm1, %v161_v23  ;;  %205 = vrot.lane.b32.xlu1 %v117_v24, %s331_s29 }
  0x95   :  { %171 = vst.msk [vmem:[%s533_s2 + $0x8] sm:$0xf] %vm168_vm1, %v154_v27 }
  0x96   :  { %182 = vst.msk [vmem:[%s533_s2 + $0x34] sm:$0xf] %vm168_vm1, %v165_v25 }
  0x97   :  { %175 = vst.msk [vmem:[%s533_s2 + $0x18] sm:$0xf] %vm168_vm1, %v158_v28 }
  0x99   :  { %v137_v29 = vpop.f32.mrf.mxu2  ;;  %v147_v30 = vpop.f32.mrf.mxu3 }
  0x9a   :  { %v162_v31 = vpack.c.bf16 %v137_v29, %v137_v29  ;;  %v119_v32 = vpop.f32.mrf.mxu0  ;;  %v129_v33 = vpop.f32.mrf.mxu1  ;;  %v166_v36 = vpack.c.bf16 %v147_v30, %v147_v30 }
  0x9b   :  { %v155_v34 = vpack.c.bf16 %v119_v32, %v119_v32  ;;  %219 = vrot.lane.b32.xlu0 %v134_v21, %s331_s29  ;;  %v159_v35 = vpack.c.bf16 %v129_v33, %v129_v33 }
  0x9c   :  { %179 = vst.msk [vmem:[%s533_s2 + $0x28] sm:$0xf] %vm168_vm1, %v162_v31  ;;  %221 = vrot.lane.b32.xlu1 %v137_v29, %s331_s29 }
  0x9d   :  { %172 = vst.msk [vmem:[%s533_s2 + $0xc] sm:$0xf] %vm168_vm1, %v155_v34 }
  0x9e   :  { %176 = vst.msk [vmem:[%s533_s2 + $0x1c] sm:$0xf] %vm168_vm1, %v159_v35 }
  0x9f   :  { %183 = vst.msk [vmem:[%s533_s2 + $0x38] sm:$0xf] %vm168_vm1, %v166_v36 }
  0xa1   :  { %v139_v37 = vpop.f32.mrf.mxu2  ;;  %v149_v38 = vpop.f32.mrf.mxu3 }
  0xa2   :  { %v163_v39 = vpack.c.bf16 %v139_v37, %v139_v37  ;;  %223 = vrot.lane.b32.xlu2 %v139_v37, %s331_s29  ;;  %v167_v40 = vpack.c.bf16 %v149_v38, %v149_v38 }
  0xa3   :  { %213 = vrot.lane.b32.xlu0 %v127_v26, %s331_s29 }
  0xa4   :  { %180 = vst.msk [vmem:[%s533_s2 + $0x2c] sm:$0xf] %vm168_vm1, %v163_v39  ;;  %207 = vrot.lane.b32.xlu1 %v119_v32, %s331_s29 }
  0xa5   :  { %184 = vst.msk [vmem:[%s533_s2 + $0x3c] sm:$0xf] %vm168_vm1, %v167_v40 }
  0xaa   :  { %229 = vrot.lane.b32.xlu2 %v147_v30, %s331_s29 }
  0xab   :  { %231 = vrot.lane.b32.xlu0 %v149_v38, %s331_s29 }
  0xac   :  { %215 = vrot.lane.b32.xlu1 %v129_v33, %s331_s29 }
  0xb4   :  { %227 = vrot.lane.b32.xlu1 %v144_v22, %s331_s29 }
  0xdd   :  { %v210_v41 = vpop.permute.xlu2 %209 }
  0xde   :  { %254 = vst.msk [vmem:[%s534_s3 + $0x20] sm:$0xff] %vm249_vm2, %v210_v41 }
  0xe5   :  { %v218_v42 = vpop.permute.xlu2 %217 }
  0xe6   :  { %258 = vst.msk [vmem:[%s534_s3 + $0x40] sm:$0xff] %vm249_vm2, %v218_v42 }
  0xed   :  { %v212_v43 = vpop.permute.xlu2 %211 }
  0xee   :  { %255 = vst.msk [vmem:[%s534_s3 + $0x28] sm:$0xff] %vm249_vm2, %v212_v43 }
  0xf5   :  { %v202_v44 = vpop.permute.xlu0 %201 }
  0xf6   :  { %250 = vst.msk [vmem:[%s534_s3] sm:$0xff] %vm249_vm2, %v202_v44 }
  0xfc   :  { %v224_v45 = vpop.permute.xlu2 %223 }
  0xfd   :  { %261 = vst.msk [vmem:[%s534_s3 + $0x58] sm:$0xff] %vm249_vm2, %v224_v45  ;;  %v226_v46 = vpop.permute.xlu0 %225 }
  0xfe   :  { %262 = vst.msk [vmem:[%s534_s3 + $0x60] sm:$0xff] %vm249_vm2, %v226_v46 }
 0x104   :  { %v230_v47 = vpop.permute.xlu2 %229 }
 0x105   :  { %264 = vst.msk [vmem:[%s534_s3 + $0x70] sm:$0xff] %vm249_vm2, %v230_v47  ;;  %v204_v48 = vpop.permute.xlu0 %203 }
 0x106   :  { %251 = vst.msk [vmem:[%s534_s3 + $0x8] sm:$0xff] %vm249_vm2, %v204_v48  ;;  %v206_v49 = vpop.permute.xlu1 %205 }
 0x107   :  { %252 = vst.msk [vmem:[%s534_s3 + $0x10] sm:$0xff] %vm249_vm2, %v206_v49 }
 0x10d   :  { %v220_v50 = vpop.permute.xlu0 %219 }
 0x10e   :  { %259 = vst.msk [vmem:[%s534_s3 + $0x48] sm:$0xff] %vm249_vm2, %v220_v50  ;;  %v222_v51 = vpop.permute.xlu1 %221 }
 0x10f   :  { %260 = vst.msk [vmem:[%s534_s3 + $0x50] sm:$0xff] %vm249_vm2, %v222_v51 }
 0x115   :  { %v214_v52 = vpop.permute.xlu0 %213 }
 0x116   :  { %256 = vst.msk [vmem:[%s534_s3 + $0x30] sm:$0xff] %vm249_vm2, %v214_v52  ;;  %v208_v53 = vpop.permute.xlu1 %207 }
 0x117   :  { %253 = vst.msk [vmem:[%s534_s3 + $0x18] sm:$0xff] %vm249_vm2, %v208_v53 }
 0x11d   :  { %v232_v54 = vpop.permute.xlu0 %231 }
 0x11e   :  { %265 = vst.msk [vmem:[%s534_s3 + $0x78] sm:$0xff] %vm249_vm2, %v232_v54  ;;  %v216_v55 = vpop.permute.xlu1 %215 }
 0x11f   :  { %257 = vst.msk [vmem:[%s534_s3 + $0x38] sm:$0xff] %vm249_vm2, %v216_v55 }
 0x126   :  { %v228_v56 = vpop.permute.xlu1 %227 }
 0x127   :  { %263 = vst.msk [vmem:[%s534_s3 + $0x68] sm:$0xff] %vm249_vm2, %v228_v56 }

// kernel: gat_forward.5
= control target key start
LH: loop header
LB: loop body
LE: loop exit
PB: predicated region body
PF: predicated region fallthrough
CT: control target
= control target key end

     0   :  { %s1163_s0 = inlined_call_operand.vmem [shape: f32[2,128,1], index: 0, kind: input, shape index: {}]   ;;  %s1164_s1 = inlined_call_operand.vmem [shape: f32[2,1,128], index: 1, kind: input, shape index: {}]   ;;  %s1165_s2 = inlined_call_operand.vmem [shape: bf16[2,128,8], index: 2, kind: input, shape index: {}]   ;;  %s1166_s3 = inlined_call_operand.vmem [shape: s8[128,128], index: 3, kind: input, shape index: {}]   ;;  %s1167_s4 = inlined_call_operand.vmem [shape: bf16[2,128,8], index: 4, kind: output, shape index: {}]  }
   0x1   :  { %v17_v0 = vld [vmem:[%s1166_s3] sm:$0xff]  ;;  %v18_v1 = vld [vmem:[%s1166_s3 + $0x8] sm:$0xff]  ;;  %v19_v2 = vld [vmem:[%s1166_s3 + $0x10] sm:$0xff] }
   0x2   :  { %v20_v3 = vld [vmem:[%s1166_s3 + $0x18] sm:$0xff]  ;;  %v21_v4 = vunpack.c.0.s8 %v17_v0  ;;  %v22_v5 = vunpack.c.1.s8 %v17_v0  ;;  %v23_v6 = vunpack.c.2.s8 %v17_v0  ;;  %v24_v7 = vunpack.c.3.s8 %v17_v0  ;;  %s914_s3 = smov 0  }
   0x3   :  { %v25_v8 = vunpack.c.0.s8 %v18_v1  ;;  %v26_v9 = vunpack.c.1.s8 %v18_v1  ;;  %v27_v10 = vunpack.c.2.s8 %v18_v1  ;;  %v28_v11 = vunpack.c.3.s8 %v18_v1 }
   0x4   :  { %v29_v12 = vunpack.c.0.s8 %v19_v2  ;;  %v30_v13 = vunpack.c.1.s8 %v19_v2  ;;  %v31_v14 = vunpack.c.2.s8 %v19_v2  ;;  %v32_v15 = vunpack.c.3.s8 %v19_v2 }
   0x5   :  { %v33_v16 = vunpack.c.0.s8 %v20_v3  ;;  %v34_v17 = vunpack.c.1.s8 %v20_v3  ;;  %v35_v18 = vunpack.c.2.s8 %v20_v3  ;;  %v36_v19 = vunpack.c.3.s8 %v20_v3 }
   0x6   :  { %v882_v20 = vcvt.s32.f32 %v21_v4  ;;  %v884_v21 = vcvt.s32.f32 %v22_v5  ;;  %v886_v22 = vcvt.s32.f32 %v23_v6  ;;  %v888_v23 = vcvt.s32.f32 %v24_v7 }
   0x7   :  { %v890_v24 = vcvt.s32.f32 %v25_v8  ;;  %v892_v25 = vcvt.s32.f32 %v26_v9  ;;  %v894_v26 = vcvt.s32.f32 %v27_v10  ;;  %v896_v27 = vcvt.s32.f32 %v28_v11 }
   0x8   :  { %v898_v28 = vcvt.s32.f32 %v29_v12  ;;  %v900_v29 = vcvt.s32.f32 %v30_v13  ;;  %v902_v30 = vcvt.s32.f32 %v31_v14  ;;  %v904_v31 = vcvt.s32.f32 %v32_v15 }
   0x9   :  { %v906_v32 = vcvt.s32.f32 %v33_v16  ;;  %v908_v33 = vcvt.s32.f32 %v34_v17  ;;  %v910_v34 = vcvt.s32.f32 %v35_v18  ;;  %v912_v35 = vcvt.s32.f32 %v36_v19 }
   0xa LB: > { %v844_v36 = vmov 0   ;;  %s641_s23 = sshll.u32 %s842_s3, 7  ;;  %s77_s26 = scalar_lea.vmem %s1164_s1, %s842_s3  ;;  %vm608_vm1 = vcmask 60416   ;;  %s842_s3 = sphi %s914_s3, %s58_s3  }
   0xb   : > { %737 = vset.pattern.permute.xlu1 %v844_v36  ;;  %736 = vset.pattern.permute.xlu0 %v844_v36  ;;  %s927_s29 = scalar_lea.vmem %s1163_s0, %s641_s23  ;;  %v950_v53 = vld [vmem:[%s77_s26] ss:$0 sm:$0xff]  ;;  %s693_s6 = sshll.u32 %s842_s3, 6 }
   0xc   : > { %738 = vset.pattern.permute.xlu2 %v844_v36  ;;  %v73_v37 = vld [vmem:[%s927_s29 + $0x60] sm:$0xff]  ;;  %v74_v40 = vld [vmem:[%s927_s29 + $0x68] sm:$0xff]  ;;  %v71_v45 = vld [vmem:[%s927_s29 + $0x50] sm:$0xff]  ;;  %s977_s9 = scalar_lea.vmem %s1165_s2, %s693_s6  ;;  %s1091_s12 = scalar_lea.vmem %s1167_s4, %s693_s6 }
   0xd   : > { %v69_v38 = vld [vmem:[%s927_s29 + $0x40] sm:$0xff]  ;;  %141 = vperm.xlu1 %737, %v73_v37   ;;  %v70_v41 = vld [vmem:[%s927_s29 + $0x48] sm:$0xff]  ;;  %v75_v46 = vld [vmem:[%s927_s29 + $0x70] sm:$0xff]  ;;  %s58_s3 = sadd.s32 1, %s842_s3  }
   0xe   : > { %v61_v39 = vld [vmem:[%s927_s29] sm:$0xff]  ;;  %121 = vperm.xlu0 %736, %v69_v38   ;;  %v62_v42 = vld [vmem:[%s927_s29 + $0x8] sm:$0xff]  ;;  %v72_v47 = vld [vmem:[%s927_s29 + $0x58] sm:$0xff]  ;;  %p55_p0 = scmp.ge.s32.totalorder %s58_s3, 2  }
   0xf   : > { %81 = vperm.xlu2 %738, %v61_v39   ;;  %v66_v43 = vld [vmem:[%s927_s29 + $0x28] sm:$0xff]  ;;  %v65_v44 = vld [vmem:[%s927_s29 + $0x20] sm:$0xff]  ;;  %v76_v48 = vld [vmem:[%s927_s29 + $0x78] sm:$0xff] }
  0x10   : > { %v64_v49 = vld [vmem:[%s927_s29 + $0x18] sm:$0xff]  ;;  %v63_v50 = vld [vmem:[%s927_s29 + $0x10] sm:$0xff] }
  0x11   : > { %v67_v51 = vld [vmem:[%s927_s29 + $0x30] sm:$0xff]  ;;  %v68_v52 = vld [vmem:[%s927_s29 + $0x38] sm:$0xff] }
  0x12   : > { %v701_v37 = vld [vmem:[%s977_s9 + $0x38] sm:$0xff] }
  0x13   : > { %704 = vmatpush.bf16.msra.mxu2 %v701_v37  ;;  %703 = vmatpush.bf16.msra.mxu1 %v701_v37 }
  0x14   : > { %705 = vmatpush.bf16.msra.mxu3 %v701_v37  ;;  %413 = vmatpush.bf16.msra.mxu0 %v701_v37 }
  0x15   : > { %146 = vperm.xlu1 %737, %v74_v40  }
  0x16   : > { %126 = vperm.xlu0 %736, %v70_v41  }
  0x17   : > { %86 = vperm.xlu2 %738, %v62_v42  }
  0x1d   : > { %106 = vperm.xlu1 %737, %v66_v43   ;;  %v700_v43 = vld [vmem:[%s977_s9 + $0x30] sm:$0xff] }
  0x1e   : > { %101 = vperm.xlu0 %736, %v65_v44   ;;  %707 = vmatpush.bf16.msra.mxu2 %v700_v43 }
  0x1f   : > { %131 = vperm.xlu2 %738, %v71_v45   ;;  %706 = vmatpush.bf16.msra.mxu1 %v700_v43 }
  0x20   : > { %708 = vmatpush.bf16.msra.mxu3 %v700_v43  ;;  %414 = vmatpush.bf16.msra.mxu0 %v700_v43 }
  0x25   : > { %151 = vperm.xlu1 %737, %v75_v46  }
  0x26   : > { %136 = vperm.xlu0 %736, %v72_v47  }
  0x27   : > { %156 = vperm.xlu2 %738, %v76_v48  }
  0x2d   : > { %96 = vperm.xlu1 %737, %v64_v49  }
  0x2e   : > { %91 = vperm.xlu0 %736, %v63_v50  }
  0x2f   : > { %111 = vperm.xlu2 %738, %v67_v51  }
  0x36   : > { %116 = vperm.xlu0 %736, %v68_v52  }
  0x69   : > { %v82_v56 = vpop.permute.xlu2 %81 }
  0x6a   : > { %v162_v59 = vadd.f32 %v950_v53, %v82_v56 }
  0x6c   : > { %v178_v0 = vmul.f32 0.2, %v162_v59 }
  0x6e   : > { %v962_v6 = vmax.f32 %v162_v59, %v178_v0 }
  0x71   : > { %v87_v4 = vpop.permute.xlu2 %86 }
  0x72   : > { %v163_v16 = vadd.f32 %v950_v53, %v87_v4 }
  0x74   : > { %v179_v38 = vmul.f32 0.2, %v163_v16 }
  0x76   : > { %v993_v46 = vmax.f32 %v163_v16, %v179_v38  ;;  %v695_v16 = vld [vmem:[%s977_s9 + $0x8] sm:$0xff] }
  0x79   : > { %v132_v17 = vpop.permute.xlu2 %131 }
  0x7a   : > { %v172_v47 = vadd.f32 %v950_v53, %v132_v17  ;;  %v694_v17 = vld [vmem:[%s977_s9] sm:$0xff] }
  0x7f   : > { %v142_v54 = vpop.permute.xlu1 %141 }
  0x80   : > { %v122_v55 = vpop.permute.xlu0 %121  ;;  %v174_v57 = vadd.f32 %v950_v53, %v142_v54  ;;  %v188_v54 = vmul.f32 0.2, %v172_v47 }
  0x81   : > { %v170_v58 = vadd.f32 %v950_v53, %v122_v55  ;;  %v157_v50 = vpop.permute.xlu2 %156 }
  0x82   : > { %v190_v60 = vmul.f32 0.2, %v174_v57  ;;  %v177_v59 = vadd.f32 %v950_v53, %v157_v50  ;;  %v1010_v0 = vmax.f32 %v172_v47, %v188_v54 }
  0x83   : > { %v186_v61 = vmul.f32 0.2, %v170_v58 }
  0x84   : > { %v957_v63 = vmax.f32 %v174_v57, %v190_v60 }
  0x85   : > { %v955_v62 = vmax.f32 %v170_v58, %v186_v61 }
  0x86   : > { %234 = vmax.xlane.f32.xlu0 %v957_v63 }
  0x87   : > { %226 = vmax.xlane.f32.xlu1 %v955_v62  ;;  %v147_v1 = vpop.permute.xlu1 %146 }
  0x88   : > { %v127_v2 = vpop.permute.xlu0 %126  ;;  %v175_v7 = vadd.f32 %v950_v53, %v147_v1 }
  0x89   : > { %v171_v3 = vadd.f32 %v950_v53, %v127_v2  ;;  %v193_v2 = vmul.f32 0.2, %v177_v59  ;;  %v112_v4 = vpop.permute.xlu2 %111 }
  0x8a   : > { %v191_v11 = vmul.f32 0.2, %v175_v7 }
  0x8b   : > { %v187_v5 = vmul.f32 0.2, %v171_v3 }
  0x8c   : > { %v982_v19 = vmax.f32 %v175_v7, %v191_v11  ;;  %v168_v7 = vadd.f32 %v950_v53, %v112_v4 }
  0x8d   : > { %v965_v8 = vmax.f32 %v171_v3, %v187_v5 }
  0x8e   : > { %v184_v11 = vmul.f32 0.2, %v168_v7 }
  0x8f   : > { %228 = vmax.xlane.f32.xlu2 %v965_v8  ;;  %210 = vmax.xlane.f32.xlu1 %v962_v6  ;;  %v107_v9 = vpop.permute.xlu1 %106 }
  0x90   : > { %v102_v10 = vpop.permute.xlu0 %101  ;;  %v167_v12 = vadd.f32 %v950_v53, %v107_v9 }
  0x91   : > { %v166_v13 = vadd.f32 %v950_v53, %v102_v10  ;;  %v1019_v10 = vmax.f32 %v177_v59, %v193_v2 }
  0x92   : > { %v183_v14 = vmul.f32 0.2, %v167_v12 }
  0x93   : > { %v182_v15 = vmul.f32 0.2, %v166_v13 }
  0x94   : > { %v984_v36 = vmax.f32 %v167_v12, %v183_v14  ;;  %v1023_v12 = vmax.f32 %v168_v7, %v184_v11  ;;  %v697_v14 = vld [vmem:[%s977_s9 + $0x18] sm:$0xff] }
  0x95   : > { %v980_v18 = vmax.f32 %v166_v13, %v182_v15  ;;  %v699_v13 = vld [vmem:[%s977_s9 + $0x28] sm:$0xff]  ;;  %v696_v15 = vld [vmem:[%s977_s9 + $0x10] sm:$0xff] }
  0x96   : > { %710 = vmatpush.bf16.msra.mxu2 %v699_v13  ;;  %709 = vmatpush.bf16.msra.mxu1 %v699_v13 }
  0x97   : > { %218 = vmax.xlane.f32.xlu0 %v980_v18  ;;  %236 = vmax.xlane.f32.xlu2 %v982_v19  ;;  %v152_v39 = vpop.permute.xlu1 %151 }
  0x98   : > { %220 = vmax.xlane.f32.xlu1 %v984_v36  ;;  %v137_v40 = vpop.permute.xlu0 %136  ;;  %v176_v41 = vadd.f32 %v950_v53, %v152_v39  ;;  %711 = vmatpush.bf16.msra.mxu3 %v699_v13 }
  0x99   : > { %v173_v42 = vadd.f32 %v950_v53, %v137_v40  ;;  %415 = vmatpush.bf16.msra.mxu0 %v699_v13 }
  0x9a   : > { %v192_v44 = vmul.f32 0.2, %v176_v41 }
  0x9b   : > { %v189_v45 = vmul.f32 0.2, %v173_v42 }
  0x9c   : > { %v998_v49 = vmax.f32 %v176_v41, %v192_v44 }
  0x9d   : > { %v996_v48 = vmax.f32 %v173_v42, %v189_v45 }
  0x9f   : > { %232 = vmax.xlane.f32.xlu0 %v996_v48  ;;  %212 = vmax.xlane.f32.xlu2 %v993_v46  ;;  %v97_v51 = vpop.permute.xlu1 %96 }
  0xa0   : > { %238 = vmax.xlane.f32.xlu1 %v998_v49  ;;  %v92_v52 = vpop.permute.xlu0 %91  ;;  %v165_v55 = vadd.f32 %v950_v53, %v97_v51 }
  0xa1   : > { %v164_v56 = vadd.f32 %v950_v53, %v92_v52 }
  0xa2   : > { %v181_v57 = vmul.f32 0.2, %v165_v55 }
  0xa3   : > { %v180_v58 = vmul.f32 0.2, %v164_v56 }
  0xa4   : > { %v1008_v61 = vmax.f32 %v165_v55, %v181_v57 }
  0xa5   : > { %v1006_v60 = vmax.f32 %v164_v56, %v180_v58 }
  0xa7   : > { %214 = vmax.xlane.f32.xlu0 %v1006_v60  ;;  %230 = vmax.xlane.f32.xlu2 %v1010_v0 }
  0xa8   : > { %216 = vmax.xlane.f32.xlu1 %v1008_v61  ;;  %v117_v1 = vpop.permute.xlu0 %116 }
  0xa9   : > { %v169_v3 = vadd.f32 %v950_v53, %v117_v1  ;;  %v698_v53 = vld [vmem:[%s977_s9 + $0x20] sm:$0xff] }
  0xaa   : > { %713 = vmatpush.bf16.msra.mxu2 %v698_v53  ;;  %712 = vmatpush.bf16.msra.mxu1 %v698_v53 }
  0xab   : > { %v185_v5 = vmul.f32 0.2, %v169_v3  ;;  %714 = vmatpush.bf16.msra.mxu3 %v698_v53  ;;  %416 = vmatpush.bf16.msra.mxu0 %v698_v53 }
  0xad   : > { %v1017_v9 = vmax.f32 %v169_v3, %v185_v5 }
  0xae   : > { %716 = vmatpush.bf16.msra.mxu2 %v697_v14  ;;  %715 = vmatpush.bf16.msra.mxu1 %v697_v14 }
  0xaf   : > { %224 = vmax.xlane.f32.xlu0 %v1017_v9  ;;  %240 = vmax.xlane.f32.xlu2 %v1019_v10 }
  0xb0   : > { %717 = vmatpush.bf16.msra.mxu3 %v697_v14  ;;  %417 = vmatpush.bf16.msra.mxu0 %v697_v14 }
  0xb2   : > { %719 = vmatpush.bf16.msra.mxu2 %v696_v15  ;;  %718 = vmatpush.bf16.msra.mxu1 %v696_v15 }
  0xb4   : > { %720 = vmatpush.bf16.msra.mxu3 %v696_v15  ;;  %418 = vmatpush.bf16.msra.mxu0 %v696_v15 }
  0xb6   : > { %722 = vmatpush.bf16.msra.mxu2 %v695_v16  ;;  %721 = vmatpush.bf16.msra.mxu1 %v695_v16 }
  0xb7   : > { %222 = vmax.xlane.f32.xlu2 %v1023_v12 }
  0xb8   : > { %723 = vmatpush.bf16.msra.mxu3 %v695_v16  ;;  %419 = vmatpush.bf16.msra.mxu0 %v695_v16 }
  0xba   : > { %725 = vmatpush.bf16.msra.mxu2 %v694_v17  ;;  %724 = vmatpush.bf16.msra.mxu1 %v694_v17 }
  0xbc   : > { %726 = vmatpush.bf16.msra.mxu3 %v694_v17  ;;  %420 = vmatpush.bf16.msra.mxu0 %v694_v17 }
  0xf9   : > { %v235_v39 = vpop.xlane.xlu0 %234 }
  0xfa   : > { %v227_v37 = vpop.xlane.xlu1 %226  ;;  %v254_v50 = vsub.f32 %v957_v63, %v235_v39 }
  0xfb   : > { %v250_v38 = vsub.f32 %v955_v62, %v227_v37 }
  0xfc   : > { %v282_v51 = vmul.f32 1.442695, %v254_v50 }
  0xfd   : > { %v274_v40 = vmul.f32 1.442695, %v250_v38 }
  0xff   : > { %740 = vpow2.f32 %v274_v40 }
 0x102   : > { %v211_v41 = vpop.xlane.xlu1 %210  ;;  %v229_v42 = vpop.xlane.xlu2 %228 }
 0x103   : > { %v242_v43 = vsub.f32 %v962_v6, %v211_v41  ;;  %v251_v44 = vsub.f32 %v965_v8, %v229_v42 }
 0x105   : > { %v258_v45 = vmul.f32 1.442695, %v242_v43  ;;  %v276_v47 = vmul.f32 1.442695, %v251_v44  ;;  %v741_v57 = vpop.eup %740 }
 0x106   : > { %v1041_v3 = vmul.f32 %v741_v57, %v898_v28 }
 0x107   : > { %742 = vpow2.f32 %v258_v45 }
 0x108   : > { %744 = vpow2.f32 %v276_v47 }
 0x109   : > { %746 = vpow2.f32 %v282_v51 }
 0x10a   : > { %v219_v52 = vpop.xlane.xlu0 %218  ;;  %v237_v54 = vpop.xlane.xlu2 %236 }
 0x10b   : > { %v246_v62 = vsub.f32 %v980_v18, %v219_v52  ;;  %v221_v55 = vpop.xlane.xlu1 %220  ;;  %v255_v56 = vsub.f32 %v982_v19, %v237_v54 }
 0x10c   : > { %v247_v6 = vsub.f32 %v984_v36, %v221_v55 }
 0x10d   : > { %v743_v58 = vpop.eup %742  ;;  %v266_v8 = vmul.f32 1.442695, %v246_v62  ;;  %v284_v59 = vmul.f32 1.442695, %v255_v56 }
 0x10e   : > { %v745_v1 = vpop.eup %744  ;;  %v268_v2 = vmul.f32 1.442695, %v247_v6  ;;  %v290_v63 = vmul.f32 %v743_v58, %v882_v20 }
 0x10f   : > { %v1044_v4 = vmul.f32 %v745_v1, %v900_v29  ;;  %748 = vpow2.f32 %v266_v8  ;;  %v747_v11 = vpop.eup %746 }
 0x110   : > { %750 = vpow2.f32 %v268_v2  ;;  %306 = vadd.xlane.f32.xlu1 %v290_v63  ;;  %v1053_v38 = vmul.f32 %v747_v11, %v906_v32 }
 0x111   : > { %752 = vpow2.f32 %v284_v59  ;;  %v342_v18 = vpack.c.bf16 %v1044_v4, %v1041_v3 }
 0x112   : > { %v233_v19 = vpop.xlane.xlu0 %232  ;;  %v213_v36 = vpop.xlane.xlu2 %212 }
 0x113   : > { %v239_v5 = vpop.xlane.xlu1 %238  ;;  %441 = vmatmul.bf16.vlgmr.msra.gmra.mxu2 %v342_v18  ;;  %v243_v7 = vsub.f32 %v993_v46, %v213_v36  ;;  %v253_v16 = vsub.f32 %v996_v48, %v233_v19 }
 0x114   : > { %v256_v52 = vsub.f32 %v998_v49, %v239_v5 }
 0x115   : > { %v749_v13 = vpop.eup %748  ;;  %v260_v53 = vmul.f32 1.442695, %v243_v7  ;;  %v280_v46 = vmul.f32 1.442695, %v253_v16 }
 0x116   : > { %v751_v14 = vpop.eup %750  ;;  %v294_v15 = vmul.f32 %v749_v13, %v890_v24 }
 0x117   : > { %v753_v17 = vpop.eup %752  ;;  %v295_v37 = vmul.f32 %v751_v14, %v892_v25  ;;  %754 = vpow2.f32 %v260_v53 }
 0x118   : > { %v1056_v39 = vmul.f32 %v753_v17, %v908_v33  ;;  %756 = vpow2.f32 %v280_v46 }
 0x119   : > { %v340_v40 = vpack.c.bf16 %v295_v37, %v294_v15 }
 0x11a   : > { %v215_v41 = vpop.xlane.xlu0 %214  ;;  %v344_v42 = vpack.c.bf16 %v1056_v39, %v1053_v38  ;;  %v231_v43 = vpop.xlane.xlu2 %230 }
 0x11b   : > { %v244_v44 = vsub.f32 %v1006_v60, %v215_v41  ;;  %431 = vmatmul.bf16.vlgmr.msra.gmra.mxu1 %v340_v40  ;;  %v217_v48 = vpop.xlane.xlu1 %216  ;;  %v252_v45 = vsub.f32 %v1010_v0, %v231_v43  ;;  %v286_v60 = vmul.f32 1.442695, %v256_v52 }
 0x11c   : > { %v245_v47 = vsub.f32 %v1008_v61, %v217_v48  ;;  %451 = vmatmul.bf16.vlgmr.msra.gmra.mxu3 %v344_v42 }
 0x11d   : > { %v262_v50 = vmul.f32 1.442695, %v244_v44  ;;  %v278_v51 = vmul.f32 1.442695, %v252_v45  ;;  %v755_v62 = vpop.eup %754 }
 0x11e   : > { %v264_v54 = vmul.f32 1.442695, %v245_v47  ;;  %v291_v55 = vmul.f32 %v755_v62, %v884_v21  ;;  %v757_v58 = vpop.eup %756 }
 0x11f   : > { %758 = vpow2.f32 %v262_v50 }
 0x120   : > { %760 = vpow2.f32 %v264_v54  ;;  %308 = vadd.xlane.f32.xlu2 %v291_v55  ;;  %v338_v57 = vpack.c.bf16 %v291_v55, %v290_v63  ;;  %v301_v63 = vmul.f32 %v757_v58, %v904_v31 }
 0x121   : > { %762 = vpow2.f32 %v278_v51 }
 0x122   : > { %v225_v56 = vpop.xlane.xlu0 %224  ;;  %v241_v0 = vpop.xlane.xlu2 %240  ;;  %421 = vmatmul.bf16.vlgmr.msra.gmra.mxu0 %v338_v57  ;;  %764 = vpow2.f32 %v286_v60 }
 0x123   : > { %v249_v61 = vsub.f32 %v1017_v9, %v225_v56  ;;  %v257_v6 = vsub.f32 %v1019_v10, %v241_v0 }
 0x125   : > { %v759_v8 = vpop.eup %758  ;;  %v272_v49 = vmul.f32 1.442695, %v249_v61  ;;  %v288_v59 = vmul.f32 1.442695, %v257_v6 }
 0x126   : > { %v761_v1 = vpop.eup %760  ;;  %v292_v2 = vmul.f32 %v759_v8, %v886_v22 }
 0x127   : > { %v763_v18 = vpop.eup %762  ;;  %766 = vpow2.f32 %v272_v49  ;;  %v293_v19 = vmul.f32 %v761_v1, %v888_v23 }
 0x128   : > { %v300_v36 = vmul.f32 %v763_v18, %v902_v30  ;;  %768 = vpow2.f32 %v288_v59  ;;  %310 = vadd.xlane.f32.xlu0 %v292_v2  ;;  %314 = vadd.xlane.f32.xlu2 %v294_v15  ;;  %v765_v7 = vpop.eup %764 }
 0x129   : > { %312 = vadd.xlane.f32.xlu1 %v293_v19  ;;  %v304_v16 = vmul.f32 %v765_v7, %v910_v34  ;;  %v339_v15 = vpack.c.bf16 %v293_v19, %v292_v2 }
 0x12a   : > { %v343_v9 = vpack.c.bf16 %v301_v63, %v300_v36  ;;  %v223_v10 = vpop.xlane.xlu2 %222 }
 0x12b   : > { %v248_v5 = vsub.f32 %v1023_v12, %v223_v10 }
 0x12c   : > { %446 = vmatmul.bf16.gmra.mxu2 %v343_v9 }
 0x12d   : > { %v767_v11 = vpop.eup %766  ;;  %v270_v13 = vmul.f32 1.442695, %v248_v5 }
 0x12e   : > { %v769_v53 = vpop.eup %768  ;;  %v297_v14 = vmul.f32 %v767_v11, %v896_v27 }
 0x12f   : > { %v305_v17 = vmul.f32 %v769_v53, %v912_v35  ;;  %770 = vpow2.f32 %v270_v13 }
 0x130   : > { %316 = vadd.xlane.f32.xlu0 %v295_v37  ;;  %320 = vadd.xlane.f32.xlu2 %v297_v14 }
 0x131   : > { %v345_v40 = vpack.c.bf16 %v305_v17, %v304_v16 }
 0x132   : > { %426 = vmatmul.bf16.gmra.mxu0 %v339_v15 }
 0x133   : > { %456 = vmatmul.bf16.gmra.mxu3 %v345_v40 }
 0x135   : > { %v771_v46 = vpop.eup %770 }
 0x136   : > { %v296_v12 = vmul.f32 %v771_v46, %v894_v26 }
 0x138   : > { %322 = vadd.xlane.f32.xlu0 %v1041_v3  ;;  %318 = vadd.xlane.f32.xlu1 %v296_v12  ;;  %v341_v41 = vpack.c.bf16 %v297_v14, %v296_v12 }
 0x139   : > { %326 = vadd.xlane.f32.xlu2 %v300_v36 }
 0x13a   : > { %436 = vmatmul.bf16.gmra.mxu1 %v341_v41 }
 0x140   : > { %328 = vadd.xlane.f32.xlu0 %v301_v63  ;;  %324 = vadd.xlane.f32.xlu1 %v1044_v4 }
 0x141   : > { %332 = vadd.xlane.f32.xlu2 %v1056_v39 }
 0x148   : > { %334 = vadd.xlane.f32.xlu0 %v304_v16  ;;  %330 = vadd.xlane.f32.xlu1 %v1053_v38 }
 0x150   : > { %336 = vadd.xlane.f32.xlu1 %v305_v17 }
 0x183   : > { %v307_v37 = vpop.xlane.xlu1 %306 }
 0x184   : > { %v462_v43 = vmax.f32 %v307_v37, 1e-20 }
 0x186   : > { %772 = vrcp.f32 %v462_v43 }
 0x18c   : > { %v773_v50 = vpop.eup %772 }
 0x193   : > { %v309_v42 = vpop.xlane.xlu2 %308 }
 0x194   : > { %v463_v45 = vmax.f32 %v309_v42, 1e-20 }
 0x196   : > { %v1080_v47 = vpop.f32.mrf.mxu2 }
 0x198   : > { %v432_v4 = vpop.f32.mrf.mxu1 }
 0x19b   : > { %v311_v44 = vpop.xlane.xlu0 %310  ;;  %v315_v48 = vpop.xlane.xlu2 %314 }
 0x19c   : > { %v466_v3 = vmax.f32 %v315_v48, 1e-20  ;;  %v313_v39 = vpop.xlane.xlu1 %312  ;;  %v464_v56 = vmax.f32 %v311_v44, 1e-20 }
 0x19d   : > { %v465_v11 = vmax.f32 %v313_v39, 1e-20 }
 0x19e   : > { %774 = vrcp.f32 %v466_v3  ;;  %v1084_v58 = vpop.f32.mrf.mxu2 }
 0x19f   : > { %v422_v51 = vpop.f32.mrf.mxu0  ;;  %776 = vrcp.f32 %v463_v45  ;;  %v1093_v46 = vpop.f32.mrf.mxu3 }
 0x1a0   : > { %v494_v52 = vmul.f32 %v773_v50, %v422_v51  ;;  %v434_v36 = vpop.f32.mrf.mxu1 }
 0x1a2   : > { %v526_v38 = vmul.f32 1.442695, %v494_v52  ;;  %vm510_vm0 = vcmp.gt.f32.partialorder %v494_v52, 0.0 }
 0x1a3   : > { %v317_v54 = vpop.xlane.xlu0 %316  ;;  %v1082_v55 = vpop.xlane.xlu2 %320 }
 0x1a4   : > { %v467_v62 = vmax.f32 %v317_v54, 1e-20  ;;  %v775_v60 = vpop.eup %774  ;;  %778 = vpow2.f32 %v526_v38  ;;  %v469_v48 = vmax.f32 %v1082_v55, 1e-20 }
 0x1a5   : > { %v498_v57 = vmul.f32 %v775_v60, %v432_v4  ;;  %v777_v0 = vpop.eup %776 }
 0x1a6   : > { %780 = vrcp.f32 %v467_v62 }
 0x1a7   : > { %v534_v61 = vmul.f32 1.442695, %v498_v57  ;;  %v424_v6 = vpop.f32.mrf.mxu0  ;;  %782 = vrcp.f32 %v464_v56  ;;  %vm514_vm2 = vcmp.gt.f32.partialorder %v498_v57, 0.0 }
 0x1a8   : > { %v495_v8 = vmul.f32 %v777_v0, %v424_v6 }
 0x1a9   : > { %784 = vpow2.f32 %v534_v61 }
 0x1aa   : > { %v779_v1 = vpop.eup %778  ;;  %v528_v2 = vmul.f32 1.442695, %v495_v8  ;;  %vm511_vm3 = vcmp.gt.f32.partialorder %v495_v8, 0.0 }
 0x1ab   : > { %v323_v49 = vpop.xlane.xlu0 %322  ;;  %v319_v59 = vpop.xlane.xlu1 %318  ;;  %v676_v63 = vadd.f32 -1.0, %v779_v1 }
 0x1ac   : > { %v470_v18 = vmax.f32 %v323_v49, 1e-20  ;;  %v781_v19 = vpop.eup %780  ;;  %v468_v9 = vmax.f32 %v319_v59, 1e-20  ;;  %v327_v10 = vpop.xlane.xlu2 %326  ;;  %786 = vpow2.f32 %v528_v2 }
 0x1ad   : > { %v499_v5 = vmul.f32 %v781_v19, %v434_v36  ;;  %v472_v7 = vmax.f32 %v327_v10, 1e-20  ;;  %v574_v13 = vsel %vm510_vm0, %v494_v52, %v676_v63  ;;  %v783_v53 = vpop.eup %782 }
 0x1ae   : > { %788 = vrcp.f32 %v470_v18  ;;  %v590_v14 = vpack.c.bf16 %v574_v13, %v574_v13  ;;  %v454_v13 = vpop.f32.mrf.mxu3 }
 0x1af   : > { %v536_v16 = vmul.f32 1.442695, %v499_v5  ;;  %790 = vrcp.f32 %v468_v9  ;;  %v785_v17 = vpop.eup %784  ;;  %v427_v40 = vpop.f32.mrf.mxu0  ;;  %vm515_vm4 = vcmp.gt.f32.partialorder %v499_v5, 0.0 }
 0x1b0   : > { %792 = vrcp.f32 %v472_v7  ;;  %v680_v15 = vadd.f32 -1.0, %v785_v17  ;;  %609 = vst.msk [vmem:[%s1091_s12] sm:$0xf] %vm608_vm1, %v590_v14  ;;  %v447_v12 = vpop.f32.mrf.mxu2  ;;  %v1097_v41 = vmul.f32 %v783_v53, %v427_v40 }
 0x1b1   : > { %794 = vpow2.f32 %v536_v16 }
 0x1b2   : > { %796 = vrcp.f32 %v465_v11  ;;  %v787_v43 = vpop.eup %786  ;;  %v578_v44 = vsel %vm514_vm2, %v498_v57, %v680_v15  ;;  %v530_v3 = vmul.f32 1.442695, %v1097_v41  ;;  %vm512_vm5 = vcmp.gt.f32.partialorder %v1097_v41, 0.0 }
 0x1b3   : > { %v329_v37 = vpop.xlane.xlu0 %328  ;;  %v325_v42 = vpop.xlane.xlu1 %324  ;;  %v594_v51 = vpack.c.bf16 %v578_v44, %v578_v44  ;;  %v677_v4 = vadd.f32 -1.0, %v787_v43 }
 0x1b4   : > { %v473_v45 = vmax.f32 %v329_v37, 1e-20  ;;  %v789_v50 = vpop.eup %788  ;;  %v471_v52 = vmax.f32 %v325_v42, 1e-20  ;;  %v333_v39 = vpop.xlane.xlu2 %332  ;;  %798 = vpow2.f32 %v530_v3 }
 0x1b5   : > { %v791_v54 = vpop.eup %790  ;;  %v1102_v38 = vmul.f32 %v789_v50, %v1080_v47  ;;  %613 = vst.msk [vmem:[%s1091_s12 + $0x10] sm:$0xf] %vm608_vm1, %v594_v51  ;;  %v575_v60 = vsel %vm511_vm3, %v495_v8, %v677_v4  ;;  %v475_v55 = vmax.f32 %v333_v39, 1e-20 }
 0x1b6   : > { %v793_v62 = vpop.eup %792  ;;  %800 = vrcp.f32 %v473_v45  ;;  %v591_v0 = vpack.c.bf16 %v575_v60, %v575_v60 }
 0x1b7   : > { %v437_v56 = vpop.f32.mrf.mxu1  ;;  %v795_v57 = vpop.eup %794  ;;  %802 = vrcp.f32 %v469_v48  ;;  %v542_v61 = vmul.f32 1.442695, %v1102_v38  ;;  %v1107_v6 = vmul.f32 %v793_v62, %v447_v12  ;;  %vm518_vm6 = vcmp.gt.f32.partialorder %v1102_v38, 0.0 }
 0x1b8   : > { %v797_v49 = vpop.eup %796  ;;  %v681_v59 = vadd.f32 -1.0, %v795_v57  ;;  %804 = vrcp.f32 %v471_v52  ;;  %v429_v47 = vpop.f32.mrf.mxu0  ;;  %v1109_v1 = vmul.f32 %v791_v54, %v437_v56  ;;  %610 = vst.msk [vmem:[%s1091_s12 + $0x4] sm:$0xf] %vm608_vm1, %v591_v0 }
 0x1b9   : > { %806 = vpow2.f32 %v542_v61  ;;  %v546_v8 = vmul.f32 1.442695, %v1107_v6  ;;  %v1114_v2 = vmul.f32 %v797_v49, %v429_v47  ;;  %v449_v14 = vpop.f32.mrf.mxu2  ;;  %vm520_vm7 = vcmp.gt.f32.partialorder %v1107_v6, 0.0  ;;  %v457_v61 = vpop.f32.mrf.mxu3 }
 0x1ba   : > { %v579_v18 = vsel %vm515_vm4, %v499_v5, %v681_v59  ;;  %808 = vrcp.f32 %v475_v55  ;;  %v538_v19 = vmul.f32 1.442695, %v1109_v1  ;;  %v799_v9 = vpop.eup %798  ;;  %vm516_vm8 = vcmp.gt.f32.partialorder %v1109_v1, 0.0 }
 0x1bb   : > { %v335_v63 = vpop.xlane.xlu0 %334  ;;  %v331_v36 = vpop.xlane.xlu1 %330  ;;  %v595_v10 = vpack.c.bf16 %v579_v18, %v579_v18  ;;  %810 = vpow2.f32 %v546_v8  ;;  %v532_v7 = vmul.f32 1.442695, %v1114_v2  ;;  %v678_v53 = vadd.f32 -1.0, %v799_v9 }
 0x1bc   : > { %v801_v11 = vpop.eup %800  ;;  %812 = vpow2.f32 %v538_v19  ;;  %v476_v16 = vmax.f32 %v335_v63, 1e-20  ;;  %v474_v17 = vmax.f32 %v331_v36, 1e-20  ;;  %vm513_vm9 = vcmp.gt.f32.partialorder %v1114_v2, 0.0 }
 0x1bd   : > { %v803_v40 = vpop.eup %802  ;;  %614 = vst.msk [vmem:[%s1091_s12 + $0x14] sm:$0xf] %vm608_vm1, %v595_v10  ;;  %v505_v5 = vmul.f32 %v801_v11, %v449_v14  ;;  %814 = vpow2.f32 %v532_v7  ;;  %v576_v12 = vsel %vm512_vm5, %v1097_v41, %v678_v53 }
 0x1be   : > { %v805_v15 = vpop.eup %804  ;;  %816 = vrcp.f32 %v476_v16  ;;  %v592_v43 = vpack.c.bf16 %v576_v12, %v576_v12 }
 0x1bf   : > { %v439_v37 = vpop.f32.mrf.mxu1  ;;  %v807_v42 = vpop.eup %806  ;;  %v503_v44 = vmul.f32 %v805_v15, %v1084_v58  ;;  %v548_v48 = vmul.f32 1.442695, %v505_v5  ;;  %818 = vrcp.f32 %v474_v17  ;;  %vm521_vm10 = vcmp.gt.f32.partialorder %v505_v5, 0.0 }
 0x1c0   : > { %v809_v3 = vpop.eup %808  ;;  %v684_v45 = vadd.f32 -1.0, %v807_v42  ;;  %v501_v50 = vmul.f32 %v803_v40, %v439_v37  ;;  %611 = vst.msk [vmem:[%s1091_s12 + $0x8] sm:$0xf] %vm608_vm1, %v592_v43 }
 0x1c1   : > { %v811_v51 = vpop.eup %810  ;;  %v544_v4 = vmul.f32 1.442695, %v503_v44  ;;  %v507_v41 = vmul.f32 %v809_v3, %v454_v13  ;;  %820 = vpow2.f32 %v548_v48  ;;  %vm519_vm11 = vcmp.gt.f32.partialorder %v503_v44, 0.0  ;;  %v459_v43 = vpop.f32.mrf.mxu3 }
 0x1c2   : > { %v813_v52 = vpop.eup %812  ;;  %v582_v39 = vsel %vm518_vm6, %v1102_v38, %v684_v45  ;;  %v686_v58 = vadd.f32 -1.0, %v811_v51  ;;  %v540_v54 = vmul.f32 1.442695, %v501_v50  ;;  %vm517_vm12 = vcmp.gt.f32.partialorder %v501_v50, 0.0 }
 0x1c3   : > { %v337_v62 = vpop.xlane.xlu1 %336  ;;  %v815_v60 = vpop.eup %814  ;;  %v598_v55 = vpack.c.bf16 %v582_v39, %v582_v39  ;;  %822 = vpow2.f32 %v544_v4  ;;  %v552_v56 = vmul.f32 1.442695, %v507_v41  ;;  %v682_v49 = vadd.f32 -1.0, %v813_v52 }
 0x1c4   : > { %v817_v57 = vpop.eup %816  ;;  %v584_v0 = vsel %vm520_vm7, %v1107_v6, %v686_v58  ;;  %v679_v38 = vadd.f32 -1.0, %v815_v60  ;;  %824 = vpow2.f32 %v540_v54  ;;  %v477_v8 = vmax.f32 %v337_v62, 1e-20 }
 0x1c5   : > { %617 = vst.msk [vmem:[%s1091_s12 + $0x20] sm:$0xf] %vm608_vm1, %v598_v55  ;;  %v600_v59 = vpack.c.bf16 %v584_v0, %v584_v0  ;;  %826 = vpow2.f32 %v552_v56  ;;  %v508_v47 = vmul.f32 %v817_v57, %v457_v61  ;;  %v819_v18 = vpop.eup %818  ;;  %v580_v63 = vsel %vm516_vm8, %v1109_v1, %v682_v49 }
 0x1c6   : > { %v577_v19 = vsel %vm513_vm9, %v1114_v2, %v679_v38  ;;  %v596_v9 = vpack.c.bf16 %v580_v63, %v580_v63  ;;  %v506_v11 = vmul.f32 %v819_v18, %v1093_v46  ;;  %828 = vrcp.f32 %v477_v8 }
 0x1c7   : > { %v821_v6 = vpop.eup %820  ;;  %619 = vst.msk [vmem:[%s1091_s12 + $0x28] sm:$0xf] %vm608_vm1, %v600_v59  ;;  %v593_v36 = vpack.c.bf16 %v577_v19, %v577_v19  ;;  %v554_v10 = vmul.f32 1.442695, %v508_v47  ;;  %vm523_vm13 = vcmp.gt.f32.partialorder %v507_v41, 0.0  ;;  %vm524_vm14 = vcmp.gt.f32.partialorder %v508_v47, 0.0 }
 0x1c8   : > { %v687_v7 = vadd.f32 -1.0, %v821_v6  ;;  %615 = vst.msk [vmem:[%s1091_s12 + $0x18] sm:$0xf] %vm608_vm1, %v596_v9  ;;  %v550_v14 = vmul.f32 1.442695, %v506_v11  ;;  %vm522_vm15 = vcmp.gt.f32.partialorder %v506_v11, 0.0 }
 0x1c9   : > { %v823_v13 = vpop.eup %822  ;;  %612 = vst.msk [vmem:[%s1091_s12 + $0xc] sm:$0xf] %vm608_vm1, %v593_v36  ;;  %830 = vpow2.f32 %v554_v10 }
 0x1ca   : > { %v825_v2 = vpop.eup %824  ;;  %v685_v53 = vadd.f32 -1.0, %v823_v13  ;;  %v585_v1 = vsel %vm521_vm10, %v505_v5, %v687_v7  ;;  %832 = vpow2.f32 %v550_v14 }
 0x1cb   : > { %v827_v16 = vpop.eup %826  ;;  %v601_v17 = vpack.c.bf16 %v585_v1, %v585_v1  ;;  %v683_v40 = vadd.f32 -1.0, %v825_v2 }
 0x1cc   : > { %v583_v15 = vsel %vm519_vm11, %v503_v44, %v685_v53  ;;  %v689_v46 = vadd.f32 -1.0, %v827_v16  ;;  %v829_v5 = vpop.eup %828 }
 0x1cd   : > { %v599_v12 = vpack.c.bf16 %v583_v15, %v583_v15  ;;  %620 = vst.msk [vmem:[%s1091_s12 + $0x2c] sm:$0xf] %vm608_vm1, %v601_v17  ;;  %v581_v37 = vsel %vm517_vm12, %v501_v50, %v683_v40  ;;  %v509_v44 = vmul.f32 %v829_v5, %v459_v43 }
 0x1ce   : > { %v587_v42 = vsel %vm523_vm13, %v507_v41, %v689_v46  ;;  %v597_v48 = vpack.c.bf16 %v581_v37, %v581_v37 }
 0x1cf   : > { %v831_v3 = vpop.eup %830  ;;  %618 = vst.msk [vmem:[%s1091_s12 + $0x24] sm:$0xf] %vm608_vm1, %v599_v12  ;;  %v603_v45 = vpack.c.bf16 %v587_v42, %v587_v42  ;;  %v556_v4 = vmul.f32 1.442695, %v509_v44  ;;  %vm525_vm0 = vcmp.gt.f32.partialorder %v509_v44, 0.0 }
 0x1d0   : > { %v690_v51 = vadd.f32 -1.0, %v831_v3  ;;  %616 = vst.msk [vmem:[%s1091_s12 + $0x1c] sm:$0xf] %vm608_vm1, %v597_v48  ;;  %v833_v50 = vpop.eup %832 }
 0x1d1   : > { %622 = vst.msk [vmem:[%s1091_s12 + $0x34] sm:$0xf] %vm608_vm1, %v603_v45  ;;  %v688_v39 = vadd.f32 -1.0, %v833_v50  ;;  %834 = vpow2.f32 %v556_v4 }
 0x1d2   : > { %v588_v52 = vsel %vm524_vm14, %v508_v47, %v690_v51 }
 0x1d3   : > { %v604_v41 = vpack.c.bf16 %v588_v52, %v588_v52  ;;  %v586_v58 = vsel %vm522_vm15, %v506_v11, %v688_v39 }
 0x1d4   : > { %v602_v54 = vpack.c.bf16 %v586_v58, %v586_v58 }
 0x1d5   : > { %623 = vst.msk [vmem:[%s1091_s12 + $0x38] sm:$0xf] %vm608_vm1, %v604_v41 }
 0x1d6   : > { %621 = vst.msk [vmem:[%s1091_s12 + $0x30] sm:$0xf] %vm608_vm1, %v602_v54 }
 0x1d7   : > { %v835_v62 = vpop.eup %834 }
 0x1d8   : > { %v691_v60 = vadd.f32 -1.0, %v835_v62 }
 0x1d9   :  { %57 = sbr.rel (!%p55_p0) target bundleno = 10 (0xa), region = 47 }
 0x1da   : > { %v589_v55 = vsel %vm525_vm0, %v509_v44, %v691_v60 }
 0x1db   : > { %v605_v56 = vpack.c.bf16 %v589_v55, %v589_v55 }
 0x1dd   : > { %624 = vst.msk [vmem:[%s1091_s12 + $0x3c] sm:$0xf] %vm608_vm1, %v605_v56 }

// kernel: gat_forward.7
= control target key start
LH: loop header
LB: loop body
LE: loop exit
PB: predicated region body
PF: predicated region fallthrough
CT: control target
= control target key end

     0   :  { %v1036_v0 = vmov 0   ;;  %vm578_vm0 = vcmask 31744   ;;  %s1548_s0 = inlined_call_operand.vmem [shape: f32[1,128,1], index: 0, kind: input, shape index: {}]   ;;  %s1549_s1 = inlined_call_operand.vmem [shape: f32[1,1,128], index: 1, kind: input, shape index: {}]   ;;  %s1550_s2 = inlined_call_operand.vmem [shape: bf16[1,128,4], index: 2, kind: input, shape index: {}]   ;;  %s1551_s3 = inlined_call_operand.vmem [shape: s8[128,128], index: 3, kind: input, shape index: {}]   ;;  %s1552_s4 = inlined_call_operand.vmem [shape: f32[1,128,4], index: 4, kind: output, shape index: {}]  }
   0x1   :  { %873 = vset.pattern.permute.xlu1 %v1036_v0  ;;  %872 = vset.pattern.permute.xlu0 %v1036_v0  ;;  %v65_v1 = vld [vmem:[%s1548_s0 + $0x60] sm:$0xff]  ;;  %v66_v4 = vld [vmem:[%s1548_s0 + $0x68] sm:$0xff]  ;;  %v63_v9 = vld [vmem:[%s1548_s0 + $0x50] sm:$0xff] }
   0x2   :  { %v61_v2 = vld [vmem:[%s1548_s0 + $0x40] sm:$0xff]  ;;  %132 = vperm.xlu1 %873, %v65_v1   ;;  %874 = vset.pattern.permute.xlu2 %v1036_v0  ;;  %v62_v5 = vld [vmem:[%s1548_s0 + $0x48] sm:$0xff]  ;;  %v67_v10 = vld [vmem:[%s1548_s0 + $0x70] sm:$0xff] }
   0x3   :  { %v53_v3 = vld [vmem:[%s1548_s0] sm:$0xff]  ;;  %112 = vperm.xlu0 %872, %v61_v2   ;;  %v54_v6 = vld [vmem:[%s1548_s0 + $0x8] sm:$0xff]  ;;  %v64_v11 = vld [vmem:[%s1548_s0 + $0x58] sm:$0xff] }
   0x4   :  { %72 = vperm.xlu2 %874, %v53_v3   ;;  %v58_v7 = vld [vmem:[%s1548_s0 + $0x28] sm:$0xff]  ;;  %v57_v8 = vld [vmem:[%s1548_s0 + $0x20] sm:$0xff]  ;;  %v68_v12 = vld [vmem:[%s1548_s0 + $0x78] sm:$0xff] }
   0x5   :  { %v56_v13 = vld [vmem:[%s1548_s0 + $0x18] sm:$0xff]  ;;  %v55_v14 = vld [vmem:[%s1548_s0 + $0x10] sm:$0xff]  ;;  %v1113_v17 = vld [vmem:[%s1549_s1] ss:$0 sm:$0xff] }
   0x6   :  { %v59_v15 = vld [vmem:[%s1548_s0 + $0x30] sm:$0xff]  ;;  %v60_v16 = vld [vmem:[%s1548_s0 + $0x38] sm:$0xff] }
   0x7   :  { %v846_v49 = vld [vmem:[%s1550_s2 + $0x38] sm:$0xff]  ;;  %v845_v55 = vld [vmem:[%s1550_s2 + $0x30] sm:$0xff] }
   0x8   :  { %848 = vmatpush.bf16.msra.mxu2 %v846_v49  ;;  %847 = vmatpush.bf16.msra.mxu1 %v846_v49 }
   0x9   :  { %849 = vmatpush.bf16.msra.mxu3 %v846_v49  ;;  %401 = vmatpush.bf16.msra.mxu0 %v846_v49 }
   0xa   :  { %137 = vperm.xlu1 %873, %v66_v4  }
   0xb   :  { %117 = vperm.xlu0 %872, %v62_v5  }
   0xc   :  { %77 = vperm.xlu2 %874, %v54_v6   ;;  %851 = vmatpush.bf16.msra.mxu2 %v845_v55 }
   0xd   :  { %850 = vmatpush.bf16.msra.mxu1 %v845_v55  ;;  %852 = vmatpush.bf16.msra.mxu3 %v845_v55 }
   0xe   :  { %402 = vmatpush.bf16.msra.mxu0 %v845_v55 }
  0x12   :  { %97 = vperm.xlu1 %873, %v58_v7  }
  0x13   :  { %92 = vperm.xlu0 %872, %v57_v8  }
  0x14   :  { %122 = vperm.xlu2 %874, %v63_v9  }
  0x1a   :  { %142 = vperm.xlu1 %873, %v67_v10  }
  0x1b   :  { %127 = vperm.xlu0 %872, %v64_v11  }
  0x1c   :  { %147 = vperm.xlu2 %874, %v68_v12  }
  0x22   :  { %87 = vperm.xlu1 %873, %v56_v13  }
  0x23   :  { %82 = vperm.xlu0 %872, %v55_v14  }
  0x24   :  { %102 = vperm.xlu2 %874, %v59_v15  }
  0x2b   :  { %107 = vperm.xlu0 %872, %v60_v16  }
  0x5e   :  { %v73_v20 = vpop.permute.xlu2 %72 }
  0x5f   :  { %v153_v23 = vadd.f32 %v1113_v17, %v73_v20 }
  0x61   :  { %v169_v28 = vmul.f32 0.2, %v153_v23 }
  0x63   :  { %v1125_v34 = vmax.f32 %v153_v23, %v169_v28  ;;  %v841_v23 = vld [vmem:[%s1550_s2 + $0x10] sm:$0xff] }
  0x66   :  { %v78_v32 = vpop.permute.xlu2 %77 }
  0x67   :  { %v154_v44 = vadd.f32 %v1113_v17, %v78_v32 }
  0x69   :  { %v170_v50 = vmul.f32 0.2, %v154_v44 }
  0x6b   :  { %v1152_v58 = vmax.f32 %v154_v44, %v170_v50 }
  0x6e   :  { %v123_v45 = vpop.permute.xlu2 %122 }
  0x6f   :  { %v163_v59 = vadd.f32 %v1113_v17, %v123_v45 }
  0x71   :  { %v179_v1 = vmul.f32 0.2, %v163_v59 }
  0x73   :  { %v1169_v9 = vmax.f32 %v163_v59, %v179_v1 }
  0x74   :  { %v133_v18 = vpop.permute.xlu1 %132 }
  0x75   :  { %v113_v19 = vpop.permute.xlu0 %112  ;;  %v165_v21 = vadd.f32 %v1113_v17, %v133_v18 }
  0x76   :  { %v161_v22 = vadd.f32 %v1113_v17, %v113_v19  ;;  %v148_v62 = vpop.permute.xlu2 %147 }
  0x77   :  { %v181_v24 = vmul.f32 0.2, %v165_v21  ;;  %v168_v6 = vadd.f32 %v1113_v17, %v148_v62 }
  0x78   :  { %v177_v25 = vmul.f32 0.2, %v161_v22 }
  0x79   :  { %v1120_v27 = vmax.f32 %v165_v21, %v181_v24  ;;  %v184_v11 = vmul.f32 0.2, %v168_v6  ;;  %v844_v21 = vld [vmem:[%s1550_s2 + $0x28] sm:$0xff] }
  0x7a   :  { %v1118_v26 = vmax.f32 %v161_v22, %v177_v25  ;;  %854 = vmatpush.bf16.msra.mxu2 %v844_v21  ;;  %853 = vmatpush.bf16.msra.mxu1 %v844_v21  ;;  %v842_v22 = vld [vmem:[%s1550_s2 + $0x18] sm:$0xff]  ;;  %v840_v24 = vld [vmem:[%s1550_s2 + $0x8] sm:$0xff]  ;;  %v839_v25 = vld [vmem:[%s1550_s2] sm:$0xff] }
  0x7b   :  { %225 = vmax.xlane.f32.xlu0 %v1120_v27  ;;  %v1178_v18 = vmax.f32 %v168_v6, %v184_v11  ;;  %855 = vmatpush.bf16.msra.mxu3 %v844_v21 }
  0x7c   :  { %217 = vmax.xlane.f32.xlu1 %v1118_v26  ;;  %v138_v29 = vpop.permute.xlu1 %137  ;;  %403 = vmatpush.bf16.msra.mxu0 %v844_v21 }
  0x7d   :  { %v118_v30 = vpop.permute.xlu0 %117  ;;  %v166_v35 = vadd.f32 %v1113_v17, %v138_v29 }
  0x7e   :  { %v162_v31 = vadd.f32 %v1113_v17, %v118_v30  ;;  %v103_v13 = vpop.permute.xlu2 %102 }
  0x7f   :  { %v182_v39 = vmul.f32 0.2, %v166_v35  ;;  %v159_v15 = vadd.f32 %v1113_v17, %v103_v13 }
  0x80   :  { %v178_v33 = vmul.f32 0.2, %v162_v31 }
  0x81   :  { %v1137_v47 = vmax.f32 %v166_v35, %v182_v39  ;;  %v175_v19 = vmul.f32 0.2, %v159_v15  ;;  %v1214_v39 = vld [vmem:[%s1551_s3 + $0x10] sm:$0xff] }
  0x82   :  { %v1128_v36 = vmax.f32 %v162_v31, %v178_v33 }
  0x83   :  { %v1182_v20 = vmax.f32 %v159_v15, %v175_v19 }
  0x84   :  { %219 = vmax.xlane.f32.xlu2 %v1128_v36  ;;  %201 = vmax.xlane.f32.xlu1 %v1125_v34  ;;  %v98_v37 = vpop.permute.xlu1 %97 }
  0x85   :  { %v93_v38 = vpop.permute.xlu0 %92  ;;  %v158_v40 = vadd.f32 %v1113_v17, %v98_v37 }
  0x86   :  { %v157_v41 = vadd.f32 %v1113_v17, %v93_v38  ;;  %v1209_v38 = vld [vmem:[%s1551_s3] sm:$0xff] }
  0x87   :  { %v174_v42 = vmul.f32 0.2, %v158_v40 }
  0x88   :  { %v173_v43 = vmul.f32 0.2, %v157_v41 }
  0x89   :  { %v1139_v48 = vmax.f32 %v158_v40, %v174_v42  ;;  %v21_v42 = vunpack.c.0.s8 %v1209_v38 }
  0x8a   :  { %v1135_v46 = vmax.f32 %v157_v41, %v173_v43 }
  0x8b   :  { %v37_v49 = vcvt.s32.f32 %v21_v42 }
  0x8c   :  { %209 = vmax.xlane.f32.xlu0 %v1135_v46  ;;  %227 = vmax.xlane.f32.xlu2 %v1137_v47  ;;  %v143_v51 = vpop.permute.xlu1 %142 }
  0x8d   :  { %211 = vmax.xlane.f32.xlu1 %v1139_v48  ;;  %v128_v52 = vpop.permute.xlu0 %127  ;;  %v167_v53 = vadd.f32 %v1113_v17, %v143_v51 }
  0x8e   :  { %v164_v54 = vadd.f32 %v1113_v17, %v128_v52 }
  0x8f   :  { %v183_v56 = vmul.f32 0.2, %v167_v53 }
  0x90   :  { %v180_v57 = vmul.f32 0.2, %v164_v54 }
  0x91   :  { %v1157_v61 = vmax.f32 %v167_v53, %v183_v56 }
  0x92   :  { %v1155_v60 = vmax.f32 %v164_v54, %v180_v57 }
  0x94   :  { %223 = vmax.xlane.f32.xlu0 %v1155_v60  ;;  %203 = vmax.xlane.f32.xlu2 %v1152_v58  ;;  %v88_v63 = vpop.permute.xlu1 %87 }
  0x95   :  { %229 = vmax.xlane.f32.xlu1 %v1157_v61  ;;  %v83_v0 = vpop.permute.xlu0 %82  ;;  %v156_v2 = vadd.f32 %v1113_v17, %v88_v63 }
  0x96   :  { %v155_v3 = vadd.f32 %v1113_v17, %v83_v0 }
  0x97   :  { %v172_v4 = vmul.f32 0.2, %v156_v2 }
  0x98   :  { %v171_v5 = vmul.f32 0.2, %v155_v3 }
  0x99   :  { %v1167_v8 = vmax.f32 %v156_v2, %v172_v4 }
  0x9a   :  { %v1165_v7 = vmax.f32 %v155_v3, %v171_v5 }
  0x9c   :  { %205 = vmax.xlane.f32.xlu0 %v1165_v7  ;;  %221 = vmax.xlane.f32.xlu2 %v1169_v9 }
  0x9d   :  { %207 = vmax.xlane.f32.xlu1 %v1167_v8  ;;  %v108_v10 = vpop.permute.xlu0 %107 }
  0x9e   :  { %v160_v12 = vadd.f32 %v1113_v17, %v108_v10  ;;  %v843_v17 = vld [vmem:[%s1550_s2 + $0x20] sm:$0xff] }
  0x9f   :  { %857 = vmatpush.bf16.msra.mxu2 %v843_v17  ;;  %856 = vmatpush.bf16.msra.mxu1 %v843_v17 }
  0xa0   :  { %v176_v14 = vmul.f32 0.2, %v160_v12  ;;  %858 = vmatpush.bf16.msra.mxu3 %v843_v17  ;;  %404 = vmatpush.bf16.msra.mxu0 %v843_v17 }
  0xa2   :  { %v1176_v16 = vmax.f32 %v160_v12, %v176_v14 }
  0xa3   :  { %860 = vmatpush.bf16.msra.mxu2 %v842_v22  ;;  %859 = vmatpush.bf16.msra.mxu1 %v842_v22 }
  0xa4   :  { %215 = vmax.xlane.f32.xlu0 %v1176_v16  ;;  %231 = vmax.xlane.f32.xlu2 %v1178_v18 }
  0xa5   :  { %861 = vmatpush.bf16.msra.mxu3 %v842_v22  ;;  %405 = vmatpush.bf16.msra.mxu0 %v842_v22 }
  0xa7   :  { %863 = vmatpush.bf16.msra.mxu2 %v841_v23  ;;  %862 = vmatpush.bf16.msra.mxu1 %v841_v23 }
  0xa9   :  { %864 = vmatpush.bf16.msra.mxu3 %v841_v23  ;;  %406 = vmatpush.bf16.msra.mxu0 %v841_v23 }
  0xab   :  { %866 = vmatpush.bf16.msra.mxu2 %v840_v24  ;;  %865 = vmatpush.bf16.msra.mxu1 %v840_v24 }
  0xac   :  { %213 = vmax.xlane.f32.xlu2 %v1182_v20 }
  0xad   :  { %867 = vmatpush.bf16.msra.mxu3 %v840_v24  ;;  %407 = vmatpush.bf16.msra.mxu0 %v840_v24 }
  0xaf   :  { %869 = vmatpush.bf16.msra.mxu2 %v839_v25  ;;  %868 = vmatpush.bf16.msra.mxu1 %v839_v25 }
  0xb1   :  { %870 = vmatpush.bf16.msra.mxu3 %v839_v25  ;;  %408 = vmatpush.bf16.msra.mxu0 %v839_v25 }
  0xee   :  { %v226_v30 = vpop.xlane.xlu0 %225 }
  0xef   :  { %v218_v28 = vpop.xlane.xlu1 %217  ;;  %v245_v41 = vsub.f32 %v1120_v27, %v226_v30  ;;  %v1225_v27 = vld [vmem:[%s1551_s3 + $0x8] sm:$0xff] }
  0xf0   :  { %v241_v29 = vsub.f32 %v1118_v26, %v218_v28  ;;  %v25_v1 = vunpack.c.0.s8 %v1225_v27 }
  0xf1   :  { %v273_v43 = vmul.f32 1.442695, %v245_v41 }
  0xf2   :  { %v265_v31 = vmul.f32 1.442695, %v241_v29  ;;  %v41_v12 = vcvt.s32.f32 %v25_v1 }
  0xf4   :  { %876 = vpow2.f32 %v265_v31 }
  0xf7   :  { %v202_v32 = vpop.xlane.xlu1 %201  ;;  %v220_v33 = vpop.xlane.xlu2 %219 }
  0xf8   :  { %v233_v35 = vsub.f32 %v1125_v34, %v202_v32  ;;  %v242_v37 = vsub.f32 %v1128_v36, %v220_v33  ;;  %v29_v34 = vunpack.c.0.s8 %v1214_v39  ;;  %v30_v36 = vunpack.c.1.s8 %v1214_v39 }
  0xf9   :  { %v22_v33 = vunpack.c.1.s8 %v1209_v38 }
  0xfa   :  { %v249_v40 = vmul.f32 1.442695, %v233_v35  ;;  %v267_v26 = vmul.f32 1.442695, %v242_v37  ;;  %v45_v53 = vcvt.s32.f32 %v29_v34  ;;  %v46_v54 = vcvt.s32.f32 %v30_v36  ;;  %v877_v55 = vpop.eup %876 }
  0xfb   :  { %v38_v36 = vcvt.s32.f32 %v22_v33 }
  0xfc   :  { %878 = vpow2.f32 %v249_v40  ;;  %v1236_v2 = vmul.f32 %v877_v55, %v45_v53 }
  0xfd   :  { %880 = vpow2.f32 %v267_v26 }
  0xfe   :  { %882 = vpow2.f32 %v273_v43 }
  0xff   :  { %v210_v44 = vpop.xlane.xlu0 %209  ;;  %v228_v45 = vpop.xlane.xlu2 %227 }
 0x100   :  { %v237_v50 = vsub.f32 %v1135_v46, %v210_v44  ;;  %v212_v51 = vpop.xlane.xlu1 %211  ;;  %v246_v52 = vsub.f32 %v1137_v47, %v228_v45  ;;  %v1231_v46 = vld [vmem:[%s1551_s3 + $0x18] sm:$0xff] }
 0x101   :  { %v238_v56 = vsub.f32 %v1139_v48, %v212_v51  ;;  %v26_v48 = vunpack.c.1.s8 %v1225_v27  ;;  %v33_v4 = vunpack.c.0.s8 %v1231_v46  ;;  %v34_v5 = vunpack.c.1.s8 %v1231_v46 }
 0x102   :  { %v879_v57 = vpop.eup %878  ;;  %v257_v59 = vmul.f32 1.442695, %v237_v50  ;;  %v275_v62 = vmul.f32 1.442695, %v246_v52  ;;  %v23_v50 = vunpack.c.2.s8 %v1209_v38 }
 0x103   :  { %v881_v63 = vpop.eup %880  ;;  %v259_v47 = vmul.f32 1.442695, %v238_v56  ;;  %v1233_v0 = vmul.f32 %v879_v57, %v37_v49  ;;  %v42_v15 = vcvt.s32.f32 %v26_v48  ;;  %v49_v21 = vcvt.s32.f32 %v33_v4 }
 0x104   :  { %884 = vpow2.f32 %v257_v59  ;;  %v1238_v3 = vmul.f32 %v881_v63, %v46_v54  ;;  %v883_v19 = vpop.eup %882  ;;  %v50_v17 = vcvt.s32.f32 %v34_v5  ;;  %v39_v56 = vcvt.s32.f32 %v23_v50 }
 0x105   :  { %886 = vpow2.f32 %v259_v47  ;;  %297 = vadd.xlane.f32.xlu1 %v1233_v0  ;;  %v1250_v31 = vmul.f32 %v883_v19, %v49_v21 }
 0x106   :  { %888 = vpow2.f32 %v275_v62  ;;  %v333_v6 = vpack.c.bf16 %v1238_v3, %v1236_v2 }
 0x107   :  { %v224_v10 = vpop.xlane.xlu0 %223  ;;  %v204_v11 = vpop.xlane.xlu2 %203 }
 0x108   :  { %v230_v13 = vpop.xlane.xlu1 %229  ;;  %429 = vmatmul.bf16.vlgmr.msra.gmra.mxu2 %v333_v6  ;;  %v234_v14 = vsub.f32 %v1152_v58, %v204_v11  ;;  %v244_v25 = vsub.f32 %v1155_v60, %v224_v10  ;;  %v28_v6 = vunpack.c.3.s8 %v1225_v27 }
 0x109   :  { %v247_v45 = vsub.f32 %v1157_v61, %v230_v13 }
 0x10a   :  { %v885_v22 = vpop.eup %884  ;;  %v251_v23 = vmul.f32 1.442695, %v234_v14  ;;  %v271_v35 = vmul.f32 1.442695, %v244_v25 }
 0x10b   :  { %v887_v24 = vpop.eup %886  ;;  %v285_v28 = vmul.f32 %v885_v22, %v41_v12  ;;  %v277_v53 = vmul.f32 1.442695, %v247_v45 }
 0x10c   :  { %v889_v29 = vpop.eup %888  ;;  %v1248_v30 = vmul.f32 %v887_v24, %v42_v15  ;;  %890 = vpow2.f32 %v251_v23  ;;  %v44_v15 = vcvt.s32.f32 %v28_v6 }
 0x10d   :  { %v1252_v32 = vmul.f32 %v889_v29, %v50_v17  ;;  %892 = vpow2.f32 %v271_v35 }
 0x10e   :  { %v331_v58 = vpack.c.bf16 %v1248_v30, %v285_v28 }
 0x10f   :  { %v206_v37 = vpop.xlane.xlu0 %205  ;;  %v335_v40 = vpack.c.bf16 %v1252_v32, %v1250_v31  ;;  %v222_v26 = vpop.xlane.xlu2 %221 }
 0x110   :  { %v235_v60 = vsub.f32 %v1165_v7, %v206_v37  ;;  %419 = vmatmul.bf16.vlgmr.msra.gmra.mxu1 %v331_v58  ;;  %v208_v41 = vpop.xlane.xlu1 %207  ;;  %v243_v42 = vsub.f32 %v1169_v9, %v222_v26  ;;  %v24_v7 = vunpack.c.3.s8 %v1209_v38  ;;  %v31_v9 = vunpack.c.2.s8 %v1214_v39 }
 0x111   :  { %v236_v34 = vsub.f32 %v1167_v8, %v208_v41  ;;  %439 = vmatmul.bf16.vlgmr.msra.gmra.mxu3 %v335_v40  ;;  %v32_v8 = vunpack.c.3.s8 %v1214_v39 }
 0x112   :  { %v253_v43 = vmul.f32 1.442695, %v235_v60  ;;  %v269_v44 = vmul.f32 1.442695, %v243_v42  ;;  %v891_v51 = vpop.eup %890  ;;  %v40_v62 = vcvt.s32.f32 %v24_v7  ;;  %v47_v63 = vcvt.s32.f32 %v31_v9 }
 0x113   :  { %v255_v49 = vmul.f32 1.442695, %v236_v34  ;;  %v282_v52 = vmul.f32 %v891_v51, %v38_v36  ;;  %v893_v38 = vpop.eup %892  ;;  %v48_v47 = vcvt.s32.f32 %v32_v8 }
 0x114   :  { %894 = vpow2.f32 %v253_v43 }
 0x115   :  { %896 = vpow2.f32 %v255_v49  ;;  %299 = vadd.xlane.f32.xlu2 %v282_v52  ;;  %v329_v55 = vpack.c.bf16 %v282_v52, %v1233_v0  ;;  %v292_v12 = vmul.f32 %v893_v38, %v48_v47 }
 0x116   :  { %898 = vpow2.f32 %v269_v44 }
 0x117   :  { %v216_v54 = vpop.xlane.xlu0 %215  ;;  %v232_v61 = vpop.xlane.xlu2 %231  ;;  %409 = vmatmul.bf16.vlgmr.msra.gmra.mxu0 %v329_v55  ;;  %900 = vpow2.f32 %v277_v53 }
 0x118   :  { %v240_v57 = vsub.f32 %v1176_v16, %v216_v54  ;;  %v248_v59 = vsub.f32 %v1178_v18, %v232_v61  ;;  %v35_v16 = vunpack.c.2.s8 %v1231_v46  ;;  %v36_v18 = vunpack.c.3.s8 %v1231_v46 }
 0x119   :  { %v27_v46 = vunpack.c.2.s8 %v1225_v27 }
 0x11a   :  { %v895_v1 = vpop.eup %894  ;;  %v263_v48 = vmul.f32 1.442695, %v240_v57  ;;  %v279_v39 = vmul.f32 1.442695, %v248_v59  ;;  %v51_v21 = vcvt.s32.f32 %v35_v16  ;;  %v52_v17 = vcvt.s32.f32 %v36_v18 }
 0x11b   :  { %v897_v4 = vpop.eup %896  ;;  %v283_v5 = vmul.f32 %v895_v1, %v39_v56  ;;  %v43_v37 = vcvt.s32.f32 %v27_v46 }
 0x11c   :  { %v899_v0 = vpop.eup %898  ;;  %902 = vpow2.f32 %v263_v48  ;;  %v284_v10 = vmul.f32 %v897_v4, %v40_v62 }
 0x11d   :  { %904 = vpow2.f32 %v279_v39  ;;  %301 = vadd.xlane.f32.xlu0 %v283_v5  ;;  %v291_v11 = vmul.f32 %v899_v0, %v47_v63  ;;  %305 = vadd.xlane.f32.xlu2 %v285_v28  ;;  %v901_v22 = vpop.eup %900 }
 0x11e   :  { %303 = vadd.xlane.f32.xlu1 %v284_v10  ;;  %v295_v33 = vmul.f32 %v901_v22, %v51_v21  ;;  %v330_v35 = vpack.c.bf16 %v284_v10, %v283_v5 }
 0x11f   :  { %v334_v13 = vpack.c.bf16 %v292_v12, %v291_v11  ;;  %v214_v14 = vpop.xlane.xlu2 %213 }
 0x120   :  { %v239_v19 = vsub.f32 %v1182_v20, %v214_v14 }
 0x121   :  { %434 = vmatmul.bf16.gmra.mxu2 %v334_v13 }
 0x122   :  { %v903_v23 = vpop.eup %902  ;;  %v261_v24 = vmul.f32 1.442695, %v239_v19 }
 0x123   :  { %v905_v25 = vpop.eup %904  ;;  %v288_v29 = vmul.f32 %v903_v23, %v44_v15 }
 0x124   :  { %906 = vpow2.f32 %v261_v24  ;;  %v296_v58 = vmul.f32 %v905_v25, %v52_v17 }
 0x125   :  { %307 = vadd.xlane.f32.xlu0 %v1248_v30  ;;  %311 = vadd.xlane.f32.xlu2 %v288_v29 }
 0x126   :  { %v336_v28 = vpack.c.bf16 %v296_v58, %v295_v33 }
 0x127   :  { %414 = vmatmul.bf16.gmra.mxu0 %v330_v35 }
 0x128   :  { %444 = vmatmul.bf16.gmra.mxu3 %v336_v28 }
 0x12a   :  { %v907_v20 = vpop.eup %906 }
 0x12b   :  { %v287_v40 = vmul.f32 %v907_v20, %v43_v37 }
 0x12d   :  { %313 = vadd.xlane.f32.xlu0 %v1236_v2  ;;  %309 = vadd.xlane.f32.xlu1 %v287_v40  ;;  %v332_v26 = vpack.c.bf16 %v288_v29, %v287_v40 }
 0x12e   :  { %317 = vadd.xlane.f32.xlu2 %v291_v11 }
 0x12f   :  { %424 = vmatmul.bf16.gmra.mxu1 %v332_v26 }
 0x135   :  { %319 = vadd.xlane.f32.xlu0 %v292_v12  ;;  %315 = vadd.xlane.f32.xlu1 %v1238_v3 }
 0x136   :  { %323 = vadd.xlane.f32.xlu2 %v1252_v32 }
 0x13d   :  { %325 = vadd.xlane.f32.xlu0 %v295_v33  ;;  %321 = vadd.xlane.f32.xlu1 %v1250_v31 }
 0x145   :  { %327 = vadd.xlane.f32.xlu1 %v296_v58 }
 0x178   :  { %v298_v27 = vpop.xlane.xlu1 %297 }
 0x179   :  { %v450_v60 = vmax.f32 %v298_v27, 1e-20 }
 0x17b   :  { %908 = vrcp.f32 %v450_v60 }
 0x181   :  { %v909_v36 = vpop.eup %908 }
 0x188   :  { %v300_v30 = vpop.xlane.xlu2 %299 }
 0x189   :  { %v451_v34 = vmax.f32 %v300_v30, 1e-20 }
 0x18b   :  { %v430_v45 = vpop.f32.mrf.mxu2 }
 0x18d   :  { %v420_v31 = vpop.f32.mrf.mxu1 }
 0x190   :  { %v302_v41 = vpop.xlane.xlu0 %301  ;;  %v306_v42 = vpop.xlane.xlu2 %305 }
 0x191   :  { %v454_v2 = vmax.f32 %v306_v42, 1e-20  ;;  %v1279_v3 = vpop.xlane.xlu1 %303  ;;  %v452_v5 = vmax.f32 %v302_v41, 1e-20 }
 0x193   :  { %910 = vrcp.f32 %v454_v2  ;;  %v1283_v47 = vpop.f32.mrf.mxu2 }
 0x194   :  { %v410_v43 = vpop.f32.mrf.mxu0  ;;  %912 = vrcp.f32 %v451_v34  ;;  %v1295_v17 = vpop.f32.mrf.mxu3 }
 0x195   :  { %v482_v44 = vmul.f32 %v909_v36, %v410_v43  ;;  %v422_v1 = vpop.f32.mrf.mxu1 }
 0x197   :  { %v514_v49 = vmul.f32 1.442695, %v482_v44  ;;  %vm498_vm1 = vcmp.gt.f32.partialorder %v482_v44, 0.0 }
 0x198   :  { %v308_v32 = vpop.xlane.xlu0 %307  ;;  %v312_v50 = vpop.xlane.xlu2 %311 }
 0x199   :  { %v911_v51 = vpop.eup %910  ;;  %914 = vpow2.f32 %v514_v49  ;;  %v455_v52 = vmax.f32 %v308_v32, 1e-20  ;;  %v457_v10 = vmax.f32 %v312_v50, 1e-20 }
 0x19a   :  { %v486_v7 = vmul.f32 %v911_v51, %v420_v31  ;;  %v913_v9 = vpop.eup %912 }
 0x19c   :  { %v412_v8 = vpop.f32.mrf.mxu0  ;;  %v522_v53 = vmul.f32 1.442695, %v486_v7  ;;  %vm502_vm2 = vcmp.gt.f32.partialorder %v486_v7, 0.0  ;;  %v442_v49 = vpop.f32.mrf.mxu3 }
 0x19d   :  { %v483_v54 = vmul.f32 %v913_v9, %v412_v8 }
 0x19e   :  { %916 = vpow2.f32 %v522_v53 }
 0x19f   :  { %v915_v56 = vpop.eup %914  ;;  %918 = vrcp.f32 %v455_v52  ;;  %v516_v57 = vmul.f32 1.442695, %v483_v54  ;;  %vm499_vm3 = vcmp.gt.f32.partialorder %v483_v54, 0.0 }
 0x1a0   :  { %v314_v55 = vpop.xlane.xlu0 %313  ;;  %v1281_v61 = vpop.xlane.xlu1 %309  ;;  %v823_v38 = vadd.f32 -1.0, %v915_v56 }
 0x1a1   :  { %v458_v59 = vmax.f32 %v314_v55, 1e-20  ;;  %v318_v62 = vpop.xlane.xlu2 %317  ;;  %920 = vpow2.f32 %v516_v57  ;;  %v456_v36 = vmax.f32 %v1281_v61, 1e-20 }
 0x1a2   :  { %v460_v63 = vmax.f32 %v318_v62, 1e-20  ;;  %v1285_v48 = vsel %vm498_vm1, %v482_v44, %v823_v38 }
 0x1a3   :  { %922 = vrcp.f32 %v458_v59  ;;  %v579_v39 = vsel %vm578_vm0, %v1285_v48, -inf }
 0x1a4   :  { %v917_v4 = vpop.eup %916  ;;  %924 = vrcp.f32 %v460_v63  ;;  %580 = vmax.xlane.f32.xlu2 %v579_v39  ;;  %v435_v46 = vpop.f32.mrf.mxu2 }
 0x1a5   :  { %v919_v6 = vpop.eup %918  ;;  %v827_v0 = vadd.f32 -1.0, %v917_v4  ;;  %926 = vrcp.f32 %v452_v5  ;;  %v415_v20 = vpop.f32.mrf.mxu0 }
 0x1a6   :  { %v1293_v21 = vmul.f32 %v919_v6, %v422_v1  ;;  %928 = vrcp.f32 %v457_v10 }
 0x1a7   :  { %v921_v11 = vpop.eup %920  ;;  %v1289_v13 = vsel %vm502_vm2, %v486_v7, %v827_v0 }
 0x1a8   :  { %v320_v16 = vpop.xlane.xlu0 %319  ;;  %v316_v18 = vpop.xlane.xlu1 %315  ;;  %v591_v19 = vsel %vm578_vm0, %v1289_v13, -inf  ;;  %v824_v24 = vadd.f32 -1.0, %v921_v11  ;;  %v524_v35 = vmul.f32 1.442695, %v1293_v21  ;;  %vm503_vm6 = vcmp.gt.f32.partialorder %v1293_v21, 0.0 }
 0x1a9   :  { %v461_v12 = vmax.f32 %v320_v16, 1e-20  ;;  %v923_v14 = vpop.eup %922  ;;  %v324_v15 = vpop.xlane.xlu2 %323  ;;  %v459_v22 = vmax.f32 %v316_v18, 1e-20  ;;  %592 = vmax.xlane.f32.xlu0 %v591_v19  ;;  %v453_v18 = vmax.f32 %v1279_v3, 1e-20 }
 0x1aa   :  { %v463_v23 = vmax.f32 %v324_v15, 1e-20  ;;  %v490_v25 = vmul.f32 %v923_v14, %v430_v45  ;;  %v925_v29 = vpop.eup %924  ;;  %v1300_v40 = vsel %vm499_vm3, %v483_v54, %v824_v24 }
 0x1ab   :  { %v492_v58 = vmul.f32 %v925_v29, %v435_v46  ;;  %930 = vrcp.f32 %v461_v12  ;;  %v927_v26 = vpop.eup %926  ;;  %v582_v2 = vsel %vm578_vm0, %v1300_v40, -inf }
 0x1ac   :  { %v1297_v33 = vpop.f32.mrf.mxu1  ;;  %932 = vrcp.f32 %v463_v23  ;;  %v530_v28 = vmul.f32 1.442695, %v490_v25  ;;  %v929_v41 = vpop.eup %928  ;;  %v1302_v42 = vmul.f32 %v927_v26, %v415_v20  ;;  %vm506_vm4 = vcmp.gt.f32.partialorder %v490_v25, 0.0 }
 0x1ad   :  { %v534_v37 = vmul.f32 1.442695, %v492_v58  ;;  %934 = vrcp.f32 %v459_v22  ;;  %v437_v54 = vpop.f32.mrf.mxu2  ;;  %vm508_vm5 = vcmp.gt.f32.partialorder %v492_v58, 0.0 }
 0x1ae   :  { %936 = vpow2.f32 %v530_v28  ;;  %v518_v51 = vmul.f32 1.442695, %v1302_v42  ;;  %vm500_vm8 = vcmp.gt.f32.partialorder %v1302_v42, 0.0 }
 0x1af   :  { %938 = vpow2.f32 %v534_v37  ;;  %v417_v37 = vpop.f32.mrf.mxu0 }
 0x1b0   :  { %v322_v27 = vpop.xlane.xlu1 %321  ;;  %v326_v30 = vpop.xlane.xlu0 %325  ;;  %940 = vpow2.f32 %v524_v35 }
 0x1b1   :  { %v462_v60 = vmax.f32 %v322_v27, 1e-20  ;;  %v931_v34 = vpop.eup %930  ;;  %583 = vmax.xlane.f32.xlu0 %v582_v2  ;;  %v464_v44 = vmax.f32 %v326_v30, 1e-20 }
 0x1b2   :  { %v933_v43 = vpop.eup %932  ;;  %v1311_v56 = vmul.f32 %v931_v34, %v437_v54 }
 0x1b3   :  { %v935_v45 = vpop.eup %934  ;;  %942 = vrcp.f32 %v462_v60  ;;  %v1308_v7 = vmul.f32 %v933_v43, %v442_v49 }
 0x1b4   :  { %v427_v32 = vpop.f32.mrf.mxu1  ;;  %v937_v50 = vpop.eup %936  ;;  %944 = vrcp.f32 %v456_v36  ;;  %v1320_v38 = vmul.f32 %v935_v45, %v1283_v47  ;;  %v536_v6 = vmul.f32 1.442695, %v1311_v56  ;;  %vm509_vm11 = vcmp.gt.f32.partialorder %v1311_v56, 0.0 }
 0x1b5   :  { %v489_v31 = vmul.f32 %v929_v41, %v427_v32  ;;  %v939_v52 = vpop.eup %938  ;;  %v831_v8 = vadd.f32 -1.0, %v937_v50  ;;  %946 = vrcp.f32 %v464_v44  ;;  %v540_v61 = vmul.f32 1.442695, %v1308_v7 }
 0x1b6   :  { %v941_v53 = vpop.eup %940  ;;  %v833_v55 = vadd.f32 -1.0, %v939_v52  ;;  %v532_v47 = vmul.f32 1.442695, %v1320_v38  ;;  %vm511_vm9 = vcmp.gt.f32.partialorder %v1308_v7, 0.0  ;;  %vm507_vm12 = vcmp.gt.f32.partialorder %v1320_v38, 0.0 }
 0x1b7   :  { %v528_v9 = vmul.f32 1.442695, %v489_v31  ;;  %v1313_v57 = vsel %vm506_vm4, %v490_v25, %v831_v8  ;;  %v828_v39 = vadd.f32 -1.0, %v941_v53  ;;  %vm505_vm7 = vcmp.gt.f32.partialorder %v489_v31, 0.0 }
 0x1b8   :  { %v603_v59 = vsel %vm578_vm0, %v1313_v57, -inf  ;;  %v1317_v62 = vsel %vm508_vm5, %v492_v58, %v833_v55  ;;  %v328_v22 = vpop.xlane.xlu1 %327 }
 0x1b9   :  { %948 = vpow2.f32 %v528_v9  ;;  %v943_v63 = vpop.eup %942  ;;  %604 = vmax.xlane.f32.xlu1 %v603_v59  ;;  %v609_v1 = vsel %vm578_vm0, %v1317_v62, -inf  ;;  %v1330_v11 = vsel %vm503_vm6, %v1293_v21, %v828_v39 }
 0x1ba   :  { %950 = vpow2.f32 %v518_v51  ;;  %610 = vmax.xlane.f32.xlu0 %v609_v1  ;;  %v494_v4 = vmul.f32 %v943_v63, %v1295_v17  ;;  %v945_v5 = vpop.eup %944  ;;  %v445_v17 = vpop.f32.mrf.mxu3  ;;  %v594_v23 = vsel %vm578_vm0, %v1330_v11, -inf }
 0x1bb   :  { %952 = vpow2.f32 %v540_v61  ;;  %v947_v0 = vpop.eup %946  ;;  %v1333_v14 = vmul.f32 %v945_v5, %v1297_v33  ;;  %v465_v33 = vmax.f32 %v328_v22, 1e-20 }
 0x1bc   :  { %v538_v10 = vmul.f32 1.442695, %v494_v4  ;;  %v496_v3 = vmul.f32 %v947_v0, %v445_v17  ;;  %vm510_vm10 = vcmp.gt.f32.partialorder %v494_v4, 0.0 }
 0x1bd   :  { %v526_v29 = vmul.f32 1.442695, %v1333_v14  ;;  %vm504_vm14 = vcmp.gt.f32.partialorder %v1333_v14, 0.0 }
 0x1be   :  { %954 = vpow2.f32 %v538_v10  ;;  %v542_v28 = vmul.f32 1.442695, %v496_v3  ;;  %vm512_vm13 = vcmp.gt.f32.partialorder %v496_v3, 0.0 }
 0x1bf   :  { %v949_v16 = vpop.eup %948  ;;  %956 = vpow2.f32 %v536_v6 }
 0x1c0   :  { %v951_v12 = vpop.eup %950  ;;  %v830_v15 = vadd.f32 -1.0, %v949_v16  ;;  %958 = vpow2.f32 %v532_v47 }
 0x1c1   :  { %v953_v19 = vpop.eup %952  ;;  %960 = vrcp.f32 %v453_v18  ;;  %595 = vmax.xlane.f32.xlu1 %v594_v23  ;;  %v825_v25 = vadd.f32 -1.0, %v951_v12 }
 0x1c2   :  { %v1337_v24 = vsel %vm505_vm7, %v489_v31, %v830_v15  ;;  %v836_v46 = vadd.f32 -1.0, %v953_v19  ;;  %962 = vpow2.f32 %v526_v29 }
 0x1c3   :  { %v600_v21 = vsel %vm578_vm0, %v1337_v24, -inf  ;;  %v1344_v20 = vsel %vm500_vm8, %v1302_v42, %v825_v25  ;;  %964 = vrcp.f32 %v465_v33 }
 0x1c4   :  { %601 = vmax.xlane.f32.xlu0 %v600_v21  ;;  %v955_v58 = vpop.eup %954  ;;  %v1348_v30 = vsel %vm511_vm9, %v1308_v7, %v836_v46  ;;  %v585_v34 = vsel %vm578_vm0, %v1344_v20, -inf  ;;  %966 = vpow2.f32 %v542_v28  ;;  %v447_v7 = vpop.f32.mrf.mxu3 }
 0x1c5   :  { %v957_v35 = vpop.eup %956  ;;  %v835_v26 = vadd.f32 -1.0, %v955_v58  ;;  %v618_v36 = vsel %vm578_vm0, %v1348_v30, -inf }
 0x1c6   :  { %v959_v27 = vpop.eup %958  ;;  %v834_v43 = vadd.f32 -1.0, %v957_v35 }
 0x1c7   :  { %v961_v60 = vpop.eup %960  ;;  %v1350_v41 = vsel %vm510_vm10, %v494_v4, %v835_v26  ;;  %v832_v44 = vadd.f32 -1.0, %v959_v27 }
 0x1c8   :  { %v485_v2 = vmul.f32 %v961_v60, %v417_v37  ;;  %v615_v42 = vsel %vm578_vm0, %v1350_v41, -inf  ;;  %v963_v32 = vpop.eup %962  ;;  %v1361_v31 = vsel %vm509_vm11, %v1311_v56, %v834_v43 }
 0x1c9   :  { %586 = vmax.xlane.f32.xlu1 %v585_v34  ;;  %616 = vmax.xlane.f32.xlu2 %v615_v42  ;;  %v965_v49 = vpop.eup %964  ;;  %v1364_v50 = vsel %vm507_vm12, %v1320_v38, %v832_v44  ;;  %v612_v52 = vsel %vm578_vm0, %v1361_v31, -inf  ;;  %v829_v54 = vadd.f32 -1.0, %v963_v32 }
 0x1ca   :  { %v520_v45 = vmul.f32 1.442695, %v485_v2  ;;  %v967_v51 = vpop.eup %966  ;;  %v606_v9 = vsel %vm578_vm0, %v1364_v50, -inf  ;;  %v497_v8 = vmul.f32 %v965_v49, %v447_v7  ;;  %vm501_vm15 = vcmp.gt.f32.partialorder %v485_v2, 0.0 }
 0x1cb   :  { %v837_v53 = vadd.f32 -1.0, %v967_v51  ;;  %v1374_v56 = vsel %vm504_vm14, %v1333_v14, %v829_v54 }
 0x1cc   :  { %619 = vmax.xlane.f32.xlu0 %v618_v36  ;;  %968 = vpow2.f32 %v520_v45  ;;  %v544_v55 = vmul.f32 1.442695, %v497_v8  ;;  %v597_v63 = vsel %vm578_vm0, %v1374_v56, -inf  ;;  %vm513_vm1 = vcmp.gt.f32.partialorder %v497_v8, 0.0 }
 0x1cd   :  { %v1371_v61 = vsel %vm512_vm13, %v496_v3, %v837_v53 }
 0x1ce   :  { %v621_v38 = vsel %vm578_vm0, %v1371_v61, -inf  ;;  %970 = vpow2.f32 %v544_v55 }
 0x1d1   :  { %613 = vmax.xlane.f32.xlu1 %v612_v52  ;;  %607 = vmax.xlane.f32.xlu2 %v606_v9 }
 0x1d2   :  { %v969_v59 = vpop.eup %968 }
 0x1d3   :  { %v826_v1 = vadd.f32 -1.0, %v969_v59 }
 0x1d4   :  { %v971_v4 = vpop.eup %970 }
 0x1d5   :  { %v1380_v39 = vsel %vm501_vm15, %v485_v2, %v826_v1  ;;  %v838_v6 = vadd.f32 -1.0, %v971_v4 }
 0x1d6   :  { %v588_v5 = vsel %vm578_vm0, %v1380_v39, -inf }
 0x1d7   :  { %v1384_v0 = vsel %vm513_vm1, %v497_v8, %v838_v6 }
 0x1d8   :  { %v624_v10 = vsel %vm578_vm0, %v1384_v0, -inf }
 0x1d9   :  { %622 = vmax.xlane.f32.xlu1 %v621_v38  ;;  %598 = vmax.xlane.f32.xlu2 %v597_v63 }
 0x1e1   :  { %589 = vmax.xlane.f32.xlu2 %v588_v5 }
 0x1e9   :  { %625 = vmax.xlane.f32.xlu2 %v624_v10 }
 0x217   :  { %v581_v47 = vpop.xlane.xlu2 %580 }
 0x218   :  { %v1389_v16 = vsub.f32 %v1285_v48, %v581_v47 }
 0x21a   :  { %v643_v18 = vmul.f32 1.442695, %v1389_v16 }
 0x21c   :  { %972 = vpow2.f32 %v643_v18  ;;  %v593_v12 = vpop.xlane.xlu0 %592 }
 0x21d   :  { %v1393_v14 = vsub.f32 %v1289_v13, %v593_v12 }
 0x21f   :  { %v651_v15 = vmul.f32 1.442695, %v1393_v14 }
 0x221   :  { %974 = vpow2.f32 %v651_v15 }
 0x222   :  { %v973_v19 = vpop.eup %972 }
 0x223   :  { %v675_v17 = vsel %vm578_vm0, %v973_v19, 0.0 }
 0x224   :  { %v584_v22 = vpop.xlane.xlu0 %583  ;;  %676 = vadd.xlane.f32.xlu0 %v675_v17 }
 0x225   :  { %v1398_v23 = vsub.f32 %v1300_v40, %v584_v22 }
 0x227   :  { %v975_v48 = vpop.eup %974  ;;  %v645_v3 = vmul.f32 1.442695, %v1398_v23 }
 0x228   :  { %v687_v21 = vsel %vm578_vm0, %v975_v48, 0.0 }
 0x229   :  { %976 = vpow2.f32 %v645_v3  ;;  %688 = vadd.xlane.f32.xlu1 %v687_v21 }
 0x22c   :  { %v605_v13 = vpop.xlane.xlu1 %604 }
 0x22d   :  { %v1403_v25 = vsub.f32 %v1313_v57, %v605_v13  ;;  %v611_v29 = vpop.xlane.xlu0 %610 }
 0x22e   :  { %v1406_v46 = vsub.f32 %v1317_v62, %v611_v29 }
 0x22f   :  { %v977_v33 = vpop.eup %976  ;;  %v659_v58 = vmul.f32 1.442695, %v1403_v25 }
 0x230   :  { %v663_v40 = vmul.f32 1.442695, %v1406_v46  ;;  %v678_v28 = vsel %vm578_vm0, %v977_v33, 0.0 }
 0x231   :  { %978 = vpow2.f32 %v659_v58  ;;  %679 = vadd.xlane.f32.xlu1 %v678_v28 }
 0x232   :  { %980 = vpow2.f32 %v663_v40 }
 0x234   :  { %v596_v35 = vpop.xlane.xlu1 %595 }
 0x235   :  { %v1412_v37 = vsub.f32 %v1330_v11, %v596_v35 }
 0x237   :  { %v602_v57 = vpop.xlane.xlu0 %601  ;;  %v979_v62 = vpop.eup %978  ;;  %v653_v27 = vmul.f32 1.442695, %v1412_v37 }
 0x238   :  { %v1415_v26 = vsub.f32 %v1337_v24, %v602_v57  ;;  %v981_v60 = vpop.eup %980  ;;  %v699_v34 = vsel %vm578_vm0, %v979_v62, 0.0 }
 0x239   :  { %982 = vpow2.f32 %v653_v27  ;;  %700 = vadd.xlane.f32.xlu2 %v699_v34  ;;  %v705_v42 = vsel %vm578_vm0, %v981_v60, 0.0 }
 0x23a   :  { %v657_v2 = vmul.f32 1.442695, %v1415_v26  ;;  %706 = vadd.xlane.f32.xlu1 %v705_v42 }
 0x23c   :  { %984 = vpow2.f32 %v657_v2  ;;  %v587_v11 = vpop.xlane.xlu1 %586  ;;  %v617_v36 = vpop.xlane.xlu2 %616 }
 0x23d   :  { %v1422_v43 = vsub.f32 %v1344_v20, %v587_v11  ;;  %v1425_v24 = vsub.f32 %v1350_v41, %v617_v36 }
 0x23f   :  { %v620_v44 = vpop.xlane.xlu0 %619  ;;  %v983_v45 = vpop.eup %982  ;;  %v647_v49 = vmul.f32 1.442695, %v1422_v43  ;;  %v667_v51 = vmul.f32 1.442695, %v1425_v24 }
 0x240   :  { %v1428_v32 = vsub.f32 %v1348_v30, %v620_v44  ;;  %v690_v9 = vsel %vm578_vm0, %v983_v45, 0.0 }
 0x241   :  { %986 = vpow2.f32 %v647_v49  ;;  %691 = vadd.xlane.f32.xlu2 %v690_v9 }
 0x242   :  { %v985_v7 = vpop.eup %984  ;;  %v669_v52 = vmul.f32 1.442695, %v1428_v32  ;;  %988 = vpow2.f32 %v667_v51 }
 0x243   :  { %v696_v20 = vsel %vm578_vm0, %v985_v7, 0.0 }
 0x244   :  { %697 = vadd.xlane.f32.xlu1 %v696_v20  ;;  %990 = vpow2.f32 %v669_v52  ;;  %v614_v41 = vpop.xlane.xlu1 %613  ;;  %v608_v30 = vpop.xlane.xlu2 %607 }
 0x245   :  { %v1436_v8 = vsub.f32 %v1361_v31, %v614_v41  ;;  %v1439_v53 = vsub.f32 %v1364_v50, %v608_v30 }
 0x247   :  { %v987_v54 = vpop.eup %986  ;;  %v665_v55 = vmul.f32 1.442695, %v1436_v8  ;;  %v661_v59 = vmul.f32 1.442695, %v1439_v53 }
 0x248   :  { %v989_v38 = vpop.eup %988  ;;  %v681_v63 = vsel %vm578_vm0, %v987_v54, 0.0 }
 0x249   :  { %992 = vpow2.f32 %v665_v55  ;;  %682 = vadd.xlane.f32.xlu2 %v681_v63  ;;  %v711_v4 = vsel %vm578_vm0, %v989_v38, 0.0 }
 0x24a   :  { %v991_v1 = vpop.eup %990  ;;  %994 = vpow2.f32 %v661_v59  ;;  %712 = vadd.xlane.f32.xlu0 %v711_v4 }
 0x24b   :  { %v714_v31 = vsel %vm578_vm0, %v991_v1, 0.0 }
 0x24c   :  { %715 = vadd.xlane.f32.xlu1 %v714_v31  ;;  %v623_v50 = vpop.xlane.xlu1 %622  ;;  %v599_v5 = vpop.xlane.xlu2 %598 }
 0x24d   :  { %v1447_v6 = vsub.f32 %v1371_v61, %v623_v50  ;;  %v1450_v10 = vsub.f32 %v1374_v56, %v599_v5 }
 0x24f   :  { %v993_v47 = vpop.eup %992  ;;  %v671_v18 = vmul.f32 1.442695, %v1447_v6  ;;  %v655_v12 = vmul.f32 1.442695, %v1450_v10 }
 0x250   :  { %v995_v15 = vpop.eup %994  ;;  %v708_v19 = vsel %vm578_vm0, %v993_v47, 0.0 }
 0x251   :  { %996 = vpow2.f32 %v671_v18  ;;  %709 = vadd.xlane.f32.xlu2 %v708_v19  ;;  %v702_v17 = vsel %vm578_vm0, %v995_v15, 0.0 }
 0x252   :  { %998 = vpow2.f32 %v655_v12  ;;  %703 = vadd.xlane.f32.xlu0 %v702_v17 }
 0x254   :  { %v590_v22 = vpop.xlane.xlu2 %589 }
 0x255   :  { %v1457_v61 = vsub.f32 %v1380_v39, %v590_v22 }
 0x257   :  { %v997_v56 = vpop.eup %996  ;;  %v649_v48 = vmul.f32 1.442695, %v1457_v61 }
 0x258   :  { %v999_v3 = vpop.eup %998  ;;  %v717_v21 = vsel %vm578_vm0, %v997_v56, 0.0 }
 0x259   :  { %1000 = vpow2.f32 %v649_v48  ;;  %718 = vadd.xlane.f32.xlu2 %v717_v21  ;;  %v693_v13 = vsel %vm578_vm0, %v999_v3, 0.0 }
 0x25a   :  { %694 = vadd.xlane.f32.xlu0 %v693_v13 }
 0x25c   :  { %v626_v29 = vpop.xlane.xlu2 %625 }
 0x25d   :  { %v1463_v33 = vsub.f32 %v1384_v0, %v626_v29 }
 0x25f   :  { %v1001_v58 = vpop.eup %1000  ;;  %v673_v40 = vmul.f32 1.442695, %v1463_v33 }
 0x260   :  { %v684_v39 = vsel %vm578_vm0, %v1001_v58, 0.0 }
 0x261   :  { %1002 = vpow2.f32 %v673_v40 }
 0x262   :  { %685 = vadd.xlane.f32.xlu0 %v684_v39 }
 0x267   :  { %v1003_v28 = vpop.eup %1002 }
 0x268   :  { %v720_v35 = vsel %vm578_vm0, %v1003_v28, 0.0 }
 0x26a   :  { %721 = vadd.xlane.f32.xlu0 %v720_v35 }
 0x297   :  { %v677_v57 = vpop.xlane.xlu0 %676 }
 0x298   :  { %1004 = vlog2.f32 %v677_v57 }
 0x29c   :  { %v689_v62 = vpop.xlane.xlu1 %688 }
 0x29d   :  { %1006 = vlog2.f32 %v689_v62 }
 0x29e   :  { %v1005_v27 = vpop.eup %1004 }
 0x29f   :  { %v724_v60 = vmul.f32 0.6931472, %v1005_v27 }
 0x2a1   :  { %v755_v0 = vsub.f32 %v1389_v16, %v724_v60 }
 0x2a3   :  { %v1007_v2 = vpop.eup %1006  ;;  %771 = vst.msk [vmem:[%s1552_s4] sm:$0xff] %vm578_vm0, %v755_v0 }
 0x2a4   :  { %v732_v34 = vmul.f32 0.6931472, %v1007_v2  ;;  %v680_v42 = vpop.xlane.xlu1 %679 }
 0x2a5   :  { %1008 = vlog2.f32 %v680_v42 }
 0x2a6   :  { %v759_v11 = vsub.f32 %v1393_v14, %v732_v34 }
 0x2a8   :  { %775 = vst.msk [vmem:[%s1552_s4 + $0x20] sm:$0xff] %vm578_vm0, %v759_v11 }
 0x2ab   :  { %v1009_v36 = vpop.eup %1008 }
 0x2ac   :  { %v726_v44 = vmul.f32 0.6931472, %v1009_v36  ;;  %v701_v45 = vpop.xlane.xlu2 %700 }
 0x2ad   :  { %v707_v16 = vpop.xlane.xlu1 %706  ;;  %1010 = vlog2.f32 %v701_v45 }
 0x2ae   :  { %v756_v49 = vsub.f32 %v1398_v23, %v726_v44  ;;  %1012 = vlog2.f32 %v707_v16 }
 0x2b0   :  { %772 = vst.msk [vmem:[%s1552_s4 + $0x8] sm:$0xff] %vm578_vm0, %v756_v49 }
 0x2b3   :  { %v1011_v51 = vpop.eup %1010 }
 0x2b4   :  { %v1013_v14 = vpop.eup %1012  ;;  %v740_v7 = vmul.f32 0.6931472, %v1011_v51  ;;  %v692_v52 = vpop.xlane.xlu2 %691 }
 0x2b5   :  { %v744_v9 = vmul.f32 0.6931472, %v1013_v14  ;;  %1014 = vlog2.f32 %v692_v52 }
 0x2b6   :  { %v763_v41 = vsub.f32 %v1403_v25, %v740_v7 }
 0x2b7   :  { %v698_v20 = vpop.xlane.xlu1 %697  ;;  %v765_v30 = vsub.f32 %v1406_v46, %v744_v9 }
 0x2b8   :  { %1016 = vlog2.f32 %v698_v20  ;;  %779 = vst.msk [vmem:[%s1552_s4 + $0x40] sm:$0xff] %vm578_vm0, %v763_v41 }
 0x2b9   :  { %781 = vst.msk [vmem:[%s1552_s4 + $0x50] sm:$0xff] %vm578_vm0, %v765_v30 }
 0x2bb   :  { %v1015_v23 = vpop.eup %1014 }
 0x2bc   :  { %v734_v55 = vmul.f32 0.6931472, %v1015_v23  ;;  %v683_v59 = vpop.xlane.xlu2 %682 }
 0x2bd   :  { %v713_v63 = vpop.xlane.xlu0 %712  ;;  %1018 = vlog2.f32 %v683_v59 }
 0x2be   :  { %v1017_v54 = vpop.eup %1016  ;;  %v760_v25 = vsub.f32 %v1412_v37, %v734_v55  ;;  %1020 = vlog2.f32 %v713_v63 }
 0x2bf   :  { %v738_v38 = vmul.f32 0.6931472, %v1017_v54  ;;  %v716_v46 = vpop.xlane.xlu1 %715 }
 0x2c0   :  { %1022 = vlog2.f32 %v716_v46  ;;  %776 = vst.msk [vmem:[%s1552_s4 + $0x28] sm:$0xff] %vm578_vm0, %v760_v25 }
 0x2c1   :  { %v762_v1 = vsub.f32 %v1415_v26, %v738_v38 }
 0x2c3   :  { %778 = vst.msk [vmem:[%s1552_s4 + $0x38] sm:$0xff] %vm578_vm0, %v762_v1  ;;  %v1019_v4 = vpop.eup %1018 }
 0x2c4   :  { %v1021_v31 = vpop.eup %1020  ;;  %v728_v50 = vmul.f32 0.6931472, %v1019_v4  ;;  %v710_v5 = vpop.xlane.xlu2 %709 }
 0x2c5   :  { %v748_v47 = vmul.f32 0.6931472, %v1021_v31  ;;  %v704_v18 = vpop.xlane.xlu0 %703  ;;  %1024 = vlog2.f32 %v710_v5 }
 0x2c6   :  { %v1023_v37 = vpop.eup %1022  ;;  %v757_v26 = vsub.f32 %v1422_v43, %v728_v50  ;;  %1026 = vlog2.f32 %v704_v18 }
 0x2c7   :  { %v750_v12 = vmul.f32 0.6931472, %v1023_v37  ;;  %v767_v15 = vsub.f32 %v1425_v24, %v748_v47 }
 0x2c8   :  { %773 = vst.msk [vmem:[%s1552_s4 + $0x10] sm:$0xff] %vm578_vm0, %v757_v26 }
 0x2c9   :  { %v768_v19 = vsub.f32 %v1428_v32, %v750_v12  ;;  %783 = vst.msk [vmem:[%s1552_s4 + $0x60] sm:$0xff] %vm578_vm0, %v767_v15 }
 0x2cb   :  { %784 = vst.msk [vmem:[%s1552_s4 + $0x68] sm:$0xff] %vm578_vm0, %v768_v19  ;;  %v1025_v43 = vpop.eup %1024 }
 0x2cc   :  { %v1027_v17 = vpop.eup %1026  ;;  %v746_v24 = vmul.f32 0.6931472, %v1025_v43  ;;  %v719_v22 = vpop.xlane.xlu2 %718 }
 0x2cd   :  { %v742_v56 = vmul.f32 0.6931472, %v1027_v17  ;;  %v695_v48 = vpop.xlane.xlu0 %694  ;;  %1028 = vlog2.f32 %v719_v22 }
 0x2ce   :  { %v766_v3 = vsub.f32 %v1436_v8, %v746_v24  ;;  %1030 = vlog2.f32 %v695_v48 }
 0x2cf   :  { %v764_v32 = vsub.f32 %v1439_v53, %v742_v56 }
 0x2d0   :  { %782 = vst.msk [vmem:[%s1552_s4 + $0x58] sm:$0xff] %vm578_vm0, %v766_v3 }
 0x2d1   :  { %780 = vst.msk [vmem:[%s1552_s4 + $0x48] sm:$0xff] %vm578_vm0, %v764_v32 }
 0x2d3   :  { %v1029_v21 = vpop.eup %1028 }
 0x2d4   :  { %v1031_v13 = vpop.eup %1030  ;;  %v752_v29 = vmul.f32 0.6931472, %v1029_v21 }
 0x2d5   :  { %v736_v58 = vmul.f32 0.6931472, %v1031_v13  ;;  %v686_v40 = vpop.xlane.xlu0 %685 }
 0x2d6   :  { %v769_v8 = vsub.f32 %v1447_v6, %v752_v29  ;;  %1032 = vlog2.f32 %v686_v40 }
 0x2d7   :  { %v761_v53 = vsub.f32 %v1450_v10, %v736_v58 }
 0x2d8   :  { %785 = vst.msk [vmem:[%s1552_s4 + $0x70] sm:$0xff] %vm578_vm0, %v769_v8 }
 0x2d9   :  { %777 = vst.msk [vmem:[%s1552_s4 + $0x30] sm:$0xff] %vm578_vm0, %v761_v53 }
 0x2dc   :  { %v1033_v39 = vpop.eup %1032 }
 0x2dd   :  { %v730_v28 = vmul.f32 0.6931472, %v1033_v39  ;;  %v722_v35 = vpop.xlane.xlu0 %721 }
 0x2de   :  { %1034 = vlog2.f32 %v722_v35 }
 0x2df   :  { %v758_v57 = vsub.f32 %v1457_v61, %v730_v28 }
 0x2e1   :  { %774 = vst.msk [vmem:[%s1552_s4 + $0x18] sm:$0xff] %vm578_vm0, %v758_v57 }
 0x2e4   :  { %v1035_v6 = vpop.eup %1034 }
 0x2e5   :  { %v754_v10 = vmul.f32 0.6931472, %v1035_v6 }
 0x2e7   :  { %v770_v62 = vsub.f32 %v1463_v33, %v754_v10 }
 0x2e9   :  { %786 = vst.msk [vmem:[%s1552_s4 + $0x78] sm:$0xff] %vm578_vm0, %v770_v62 }

</bundles_post_ra>
